<compile_context>
chip_gen: v6e
topology: v6e:2x2x1
jax: 0.10.0
libtpu: 0.0.40
codegen_flags: <defaults>
</compile_context>

<pallas_src>
import jax
import jax.numpy as jnp
import numpy as np
from jax import lax
from jax.experimental import pallas as pl
from jax.experimental.pallas import tpu as pltpu


def _round_up(x, m):
    return (x + m - 1) // m * m


def _vmem_capacity_bytes():
    """Best-effort physical VMEM query; conservative (v7x-class) fallback."""
    try:
        info = pltpu.get_tpu_info()
        for attr in ("vmem_capacity_bytes", "vmem_size_bytes", "vmem_bytes"):
            v = getattr(info, attr, None)
            if v:
                return int(v)
    except Exception:
        pass
    return 64 << 20


def _din_attention_kernel(
    b3_ref,   # SMEM (1,)        f32   final-layer bias
    q_ref,    # VMEM (TB, 1, E)        query block (compute dtype)
    k_ref,    # VMEM (TB, Tp, E)       keys block, invalid rows pre-zeroed
    wk_ref,   # VMEM (E, Hp1)          W1k - W1d
    wp_ref,   # VMEM (E, Hp1)          W1p
    wq_ref,   # VMEM (E, Hp1)          W1q + W1d
    b1_ref,   # VMEM (1, Hp1)    f32
    w2_ref,   # VMEM (Hp1, Hp2)
    b2_ref,   # VMEM (1, Hp2)    f32
    w3_ref,   # VMEM (1, Hp2)    f32   W3.T, zero padded
    o_ref,    # VMEM (TB, E)     f32
):
    TB, Tp, E = k_ref.shape
    R = TB * Tp

    k3 = k_ref[...]                                           # (TB, Tp, E)
    q3 = q_ref[...]                                           # (TB, 1,  E)

    # Flatten to (R, E); reshapes only merge the leading dim into an aligned
    # sublane axis (Tp is a multiple of the sublane tile), so they are cheap.
    kf = k3.reshape(R, E)
    qf = jnp.broadcast_to(q3, (TB, Tp, E)).reshape(R, E)
    pf = kf * qf                                              # q * k, all rows

    # Folded layer 1 of the LocalActivationUnit DNN, batched over all R rows.
    h1 = jnp.dot(kf, wk_ref[...], preferred_element_type=jnp.float32)
    h1 = h1 + jnp.dot(pf, wp_ref[...], preferred_element_type=jnp.float32)
    h1 = h1 + jnp.dot(qf, wq_ref[...], preferred_element_type=jnp.float32)
    h1 = jax.nn.sigmoid(h1 + b1_ref[...])                     # (R, Hp1) f32

    # Layer 2.
    h2 = jax.nn.sigmoid(
        jnp.dot(h1.astype(w2_ref.dtype), w2_ref[...],
                preferred_element_type=jnp.float32) + b2_ref[...])  # (R, Hp2)

    # Layer 3 (H2 -> 1): VPU mul + one lane reduce (no N=1 MXU pass).
    score = jnp.sum(h2 * w3_ref[...], axis=-1, keepdims=True) + b3_ref[0]  # (R, 1)

    # pooled[b, e] = sum_t score[b, t] * keys[b, t, e]
    # Invalid / padded key rows were zeroed in the wrapper, so no mask needed.
    weighted = score * kf.astype(jnp.float32)                 # (R, E)
    pooled = jnp.sum(weighted.reshape(TB, Tp, E), axis=1)     # (TB, E)
    o_ref[...] = pooled.astype(o_ref.dtype)                   # one dense store


def attention_sequence_pooling(query, keys, keys_length, params, *,
                               compute_dtype=jnp.bfloat16):
    """query:(B,1,E), keys:(B,T,E), keys_length:(B,1) int -> (B,1,E) f32."""
    B, T, E = keys.shape
    W1 = jnp.asarray(params["W1"], jnp.float32)
    b1 = jnp.asarray(params["b1"], jnp.float32)
    W2 = jnp.asarray(params["W2"], jnp.float32)
    b2 = jnp.asarray(params["b2"], jnp.float32)
    W3 = jnp.asarray(params["W3"], jnp.float32)
    b3 = jnp.asarray(params["b3"], jnp.float32)
    H1, H2 = W1.shape[1], W2.shape[1]
    cdt = jnp.dtype(compute_dtype)

    # ---- fold W1 over concat([q, k, q-k, q*k]) in f32, then cast ------------
    W1q, W1k, W1d, W1p = W1[:E], W1[E:2 * E], W1[2 * E:3 * E], W1[3 * E:4 * E]
    Wk_eff = W1k - W1d
    Wq_eff = W1q + W1d

    Hp1, Hp2 = _round_up(H1, 128), _round_up(H2, 128)

    def pad2(a, rows, cols):
        return jnp.pad(a, ((0, rows - a.shape[0]), (0, cols - a.shape[1])))

    wk = pad2(Wk_eff, E, Hp1).astype(cdt)
    wp = pad2(W1p, E, Hp1).astype(cdt)
    wq = pad2(Wq_eff, E, Hp1).astype(cdt)
    b1p = pad2(b1.reshape(1, H1), 1, Hp1)                       # f32
    w2p = pad2(W2, Hp1, Hp2).astype(cdt)
    b2p = pad2(b2.reshape(1, H2), 1, Hp2)                       # f32
    w3row = pad2(W3.reshape(H2, 1).T, 1, Hp2)                   # f32
    b3s = b3.reshape(1)                                         # SMEM scalar

    # ---- sequence-axis padding (sublane packing for the compute dtype) ------
    sub = 16 if cdt.itemsize < 4 else 8
    Tp = _round_up(T, sub)

    # ---- generation-aware batch-tile selection -------------------------------
    vmem_phys = _vmem_capacity_bytes()
    big_vmem = vmem_phys >= (96 << 20)        # v5e / v6e (128 MiB); v7x: 64 MiB/TC
    step_budget = (16 << 20) if big_vmem else (8 << 20)
    min_steps = 2 if big_vmem else 4          # v7x: 2 TCs split the parallel axis

    def step_bytes(tb):
        r = tb * Tp
        keys_blk = r * E * cdt.itemsize
        qo_blk = tb * E * (cdt.itemsize + 4)
        inter = r * ((Hp1 + Hp2) * 4 + (Hp1 + 3 * E) * cdt.itemsize + (E + 1) * 4)
        return 2 * (keys_blk + qo_blk) + inter

    TB = 16
    while (step_bytes(2 * TB) <= step_budget
           and _round_up(B, 2 * TB) // (2 * TB) >= min_steps):
        TB *= 2
    B_pad = _round_up(B, TB)

    weight_bytes = ((3 * E * Hp1 + Hp1 * Hp2) * cdt.itemsize
                    + (Hp1 + 2 * Hp2) * 4)
    need = step_bytes(TB) + 2 * weight_bytes + (2 << 20)
    vmem_limit = None
    if need > (28 << 20):
        vmem_limit = int(min((96 << 20) if big_vmem else (48 << 20),
                             need + (8 << 20)))

    # ---- fold the length mask into the keys stream (exact for no-softmax) ----
    kl = jnp.asarray(keys_length).reshape(B, 1).astype(jnp.int32)
    valid = (jnp.arange(T, dtype=jnp.int32)[None, :] < kl)          # (B, T)
    keys_m = jnp.asarray(keys, jnp.float32) * valid[:, :, None].astype(jnp.float32)
    k_in = jnp.pad(keys_m, ((0, B_pad - B), (0, Tp - T), (0, 0))).astype(cdt)
    q_in = jnp.pad(jnp.asarray(query, jnp.float32),
                   ((0, B_pad - B), (0, 0), (0, 0))).astype(cdt)

    full = lambda shp: pl.BlockSpec(shp, lambda g: tuple(0 for _ in shp))

    cp_kwargs = dict(dimension_semantics=("parallel",))
    if vmem_limit is not None:
        cp_kwargs["vmem_limit_bytes"] = vmem_limit

    out2 = pl.pallas_call(
        _din_attention_kernel,
        out_shape=jax.ShapeDtypeStruct((B_pad, E), jnp.float32),
        grid=(B_pad // TB,),
        in_specs=[
            pl.BlockSpec(memory_space=pltpu.SMEM),               # b3 (1,)
            pl.BlockSpec((TB, 1, E), lambda g: (g, 0, 0)),       # query
            pl.BlockSpec((TB, Tp, E), lambda g: (g, 0, 0)),      # keys (masked)
            full((E, Hp1)), full((E, Hp1)), full((E, Hp1)),      # wk, wp, wq
            full((1, Hp1)),                                      # b1
            full((Hp1, Hp2)), full((1, Hp2)), full((1, Hp2)),    # w2, b2, w3
        ],
        out_specs=pl.BlockSpec((TB, E), lambda g: (g, 0)),
        compiler_params=pltpu.CompilerParams(**cp_kwargs),
    )(b3s, q_in, k_in, wk, wp, wq, b1p, w2p, b2p, w3row)

    return out2[:B].reshape(B, 1, E)


def _reference_forward(query, keys, keys_length, params):
    """Pure-JAX f32 reference mirroring the PyTorch module (weight_normalization=False)."""
    B, T, E = keys.shape
    q = jnp.broadcast_to(query, keys.shape)
    att_in = jnp.concatenate([q, keys, q - keys, q * keys], axis=-1)         # (B,T,4E)
    h = jax.nn.sigmoid(att_in @ params["W1"] + params["b1"])
    h = jax.nn.sigmoid(h @ params["W2"] + params["b2"])
    score = h @ params["W3"] + params["b3"]                                  # (B,T,1)
    score = jnp.transpose(score, (0, 2, 1))                                  # (B,1,T)
    mask = (jnp.arange(T)[None, :] < keys_length)[:, None, :]                # (B,1,T)
    score = jnp.where(mask, score, jnp.zeros_like(score))
    return score @ keys                                                       # (B,1,E)


if __name__ == "__main__":
    # Small shapes consistent with the module defaults (embedding_dim=4).
    # B and T chosen to exercise both batch and sequence padding paths.
    B, T, E = 13, 10, 4
    H1, H2 = 80, 40   # att_hidden_units=(80, 40)

    key = jax.random.PRNGKey(0)
    k_q, k_k, k_len, k_w1, k_b1, k_w2, k_b2, k_w3, k_b3 = jax.random.split(key, 9)

    query = jax.random.normal(k_q, (B, 1, E), dtype=jnp.float32)
    keys = jax.random.normal(k_k, (B, T, E), dtype=jnp.float32)
    keys_length = jax.random.randint(k_len, (B, 1), 1, T + 1).astype(jnp.int32)

    # Deterministic synthetic parameters (LocalActivationUnit: DNN(4E->80->40) + Linear(40->1)).
    params = {
        "W1": 0.1 * jax.random.normal(k_w1, (4 * E, H1), dtype=jnp.float32),
        "b1": 0.01 * jax.random.normal(k_b1, (H1,), dtype=jnp.float32),
        "W2": 0.1 * jax.random.normal(k_w2, (H1, H2), dtype=jnp.float32),
        "b2": 0.01 * jax.random.normal(k_b2, (H2,), dtype=jnp.float32),
        "W3": 0.1 * jax.random.normal(k_w3, (H2, 1), dtype=jnp.float32),
        "b3": 0.01 * jax.random.normal(k_b3, (1,), dtype=jnp.float32),
    }

    # Perf path (bf16 MXU operands, f32 accumulation).
    out_bf16 = attention_sequence_pooling(query, keys, keys_length, params)
    out_bf16 = jax.block_until_ready(out_bf16)

    # Exact-algebra validation path (f32 end to end).
    out_f32 = attention_sequence_pooling(query, keys, keys_length, params,
                                         compute_dtype=jnp.float32)
    out_f32 = jax.block_until_ready(out_f32)

    ref = _reference_forward(query, keys, keys_length, params)

    np.testing.assert_allclose(np.asarray(out_f32), np.asarray(ref),
                               rtol=1e-4, atol=1e-4)
    np.testing.assert_allclose(np.asarray(out_bf16), np.asarray(ref),
                               rtol=5e-2, atol=5e-2)

    assert out_bf16.shape == (B, 1, E)
    assert out_f32.shape == (B, 1, E)
    print("KERNEL_OK")
</pallas_src>

<mosaic_0001>
module attributes {stable_mosaic.version = 11 : i64} {
  func.func @_din_attention_kernel(%arg0: i32, %arg1: memref<1xf32, #tpu.memory_space<smem>>, %arg2: memref<16x1x4xbf16, #tpu.memory_space<vmem>>, %arg3: memref<16x16x4xbf16, #tpu.memory_space<vmem>>, %arg4: memref<4x128xbf16, #tpu.memory_space<vmem>>, %arg5: memref<4x128xbf16, #tpu.memory_space<vmem>>, %arg6: memref<4x128xbf16, #tpu.memory_space<vmem>>, %arg7: memref<1x128xf32, #tpu.memory_space<vmem>>, %arg8: memref<128x128xbf16, #tpu.memory_space<vmem>>, %arg9: memref<1x128xf32, #tpu.memory_space<vmem>>, %arg10: memref<1x128xf32, #tpu.memory_space<vmem>>, %arg11: memref<16x4xf32, #tpu.memory_space<vmem>>) attributes {dimension_semantics = [#tpu.dimension_semantics<parallel>], iteration_bounds = array<i64: 1>, scalar_prefetch = 0 : i64, scratch_operands = 0 : i64, tpu.core_type = #tpu.core_type<tc>, window_params = [{transform_indices = @transform_0, window_bounds = array<i64: 1>}, {transform_indices = @transform_1, window_bounds = array<i64: 16, 1, 4>}, {transform_indices = @transform_2, window_bounds = array<i64: 16, 16, 4>}, {pipeline_mode = #tpu.pipeline_mode<synchronous>, transform_indices = @transform_3, window_bounds = array<i64: 4, 128>}, {pipeline_mode = #tpu.pipeline_mode<synchronous>, transform_indices = @transform_4, window_bounds = array<i64: 4, 128>}, {pipeline_mode = #tpu.pipeline_mode<synchronous>, transform_indices = @transform_5, window_bounds = array<i64: 4, 128>}, {pipeline_mode = #tpu.pipeline_mode<synchronous>, transform_indices = @transform_6, window_bounds = array<i64: 1, 128>}, {pipeline_mode = #tpu.pipeline_mode<synchronous>, transform_indices = @transform_7, window_bounds = array<i64: 128, 128>}, {pipeline_mode = #tpu.pipeline_mode<synchronous>, transform_indices = @transform_8, window_bounds = array<i64: 1, 128>}, {pipeline_mode = #tpu.pipeline_mode<synchronous>, transform_indices = @transform_9, window_bounds = array<i64: 1, 128>}, {transform_indices = @transform_10, window_bounds = array<i64: 16, 4>}]} {
    %c0 = arith.constant 0 : index
    %c0_0 = arith.constant 0 : index
    %c0_1 = arith.constant 0 : index
    %0 = vector.load %arg3[%c0, %c0_0, %c0_1] : memref<16x16x4xbf16, #tpu.memory_space<vmem>>, vector<16x16x4xbf16>
    %c0_2 = arith.constant 0 : index
    %c0_3 = arith.constant 0 : index
    %c0_4 = arith.constant 0 : index
    %1 = vector.load %arg2[%c0_2, %c0_3, %c0_4] : memref<16x1x4xbf16, #tpu.memory_space<vmem>>, vector<16x1x4xbf16>
    %2 = vector.shape_cast %0 : vector<16x16x4xbf16> to vector<256x4xbf16>
    %3 = vector.shape_cast %1 : vector<16x1x4xbf16> to vector<16x1x4xbf16>
    %4 = vector.broadcast %3 : vector<16x1x4xbf16> to vector<16x16x4xbf16>
    %5 = vector.shape_cast %4 : vector<16x16x4xbf16> to vector<256x4xbf16>
    %6 = arith.mulf %2, %5 : vector<256x4xbf16>
    %c0_5 = arith.constant 0 : index
    %c0_6 = arith.constant 0 : index
    %7 = vector.load %arg4[%c0_5, %c0_6] : memref<4x128xbf16, #tpu.memory_space<vmem>>, vector<4x128xbf16>
    %cst = arith.constant dense<0.000000e+00> : vector<256x128xf32>
    %8 = tpu.matmul %2, %7, %cst {dimension_numbers = #tpu.dot_dimension_numbers<[1], [0], [0], [1], [0, 0, 1, 1], [], []>} : vector<256x4xbf16>, vector<4x128xbf16>, vector<256x128xf32> -> vector<256x128xf32>
    %c0_7 = arith.constant 0 : index
    %c0_8 = arith.constant 0 : index
    %9 = vector.load %arg5[%c0_7, %c0_8] : memref<4x128xbf16, #tpu.memory_space<vmem>>, vector<4x128xbf16>
    %cst_9 = arith.constant dense<0.000000e+00> : vector<256x128xf32>
    %10 = tpu.matmul %6, %9, %cst_9 {dimension_numbers = #tpu.dot_dimension_numbers<[1], [0], [0], [1], [0, 0, 1, 1], [], []>} : vector<256x4xbf16>, vector<4x128xbf16>, vector<256x128xf32> -> vector<256x128xf32>
    %11 = arith.addf %8, %10 : vector<256x128xf32>
    %c0_10 = arith.constant 0 : index
    %c0_11 = arith.constant 0 : index
    %12 = vector.load %arg6[%c0_10, %c0_11] : memref<4x128xbf16, #tpu.memory_space<vmem>>, vector<4x128xbf16>
    %cst_12 = arith.constant dense<0.000000e+00> : vector<256x128xf32>
    %13 = tpu.matmul %5, %12, %cst_12 {dimension_numbers = #tpu.dot_dimension_numbers<[1], [0], [0], [1], [0, 0, 1, 1], [], []>} : vector<256x4xbf16>, vector<4x128xbf16>, vector<256x128xf32> -> vector<256x128xf32>
    %14 = arith.addf %11, %13 : vector<256x128xf32>
    %c0_13 = arith.constant 0 : index
    %c0_14 = arith.constant 0 : index
    %15 = vector.load %arg7[%c0_13, %c0_14] : memref<1x128xf32, #tpu.memory_space<vmem>>, vector<1x128xf32>
    %16 = vector.broadcast %15 : vector<1x128xf32> to vector<256x128xf32>
    %17 = arith.addf %14, %16 : vector<256x128xf32>
    %18 = arith.negf %17 : vector<256x128xf32>
    %19 = math.exp %18 : vector<256x128xf32>
    %cst_15 = arith.constant 1.000000e+00 : f32
    %20 = vector.broadcast %cst_15 : f32 to vector<256x128xf32>
    %21 = arith.addf %20, %19 : vector<256x128xf32>
    %22 = arith.divf %20, %21 : vector<256x128xf32>
    %23 = arith.truncf %22 : vector<256x128xf32> to vector<256x128xbf16>
    %c0_16 = arith.constant 0 : index
    %c0_17 = arith.constant 0 : index
    %24 = vector.load %arg8[%c0_16, %c0_17] : memref<128x128xbf16, #tpu.memory_space<vmem>>, vector<128x128xbf16>
    %cst_18 = arith.constant dense<0.000000e+00> : vector<256x128xf32>
    %25 = tpu.matmul %23, %24, %cst_18 {dimension_numbers = #tpu.dot_dimension_numbers<[1], [0], [0], [1], [0, 0, 1, 1], [], []>} : vector<256x128xbf16>, vector<128x128xbf16>, vector<256x128xf32> -> vector<256x128xf32>
    %c0_19 = arith.constant 0 : index
    %c0_20 = arith.constant 0 : index
    %26 = vector.load %arg9[%c0_19, %c0_20] : memref<1x128xf32, #tpu.memory_space<vmem>>, vector<1x128xf32>
    %27 = vector.broadcast %26 : vector<1x128xf32> to vector<256x128xf32>
    %28 = arith.addf %25, %27 : vector<256x128xf32>
    %29 = arith.negf %28 : vector<256x128xf32>
    %30 = math.exp %29 : vector<256x128xf32>
    %cst_21 = arith.constant 1.000000e+00 : f32
    %31 = vector.broadcast %cst_21 : f32 to vector<256x128xf32>
    %32 = arith.addf %31, %30 : vector<256x128xf32>
    %33 = arith.divf %31, %32 : vector<256x128xf32>
    %c0_22 = arith.constant 0 : index
    %c0_23 = arith.constant 0 : index
    %34 = vector.load %arg10[%c0_22, %c0_23] : memref<1x128xf32, #tpu.memory_space<vmem>>, vector<1x128xf32>
    %35 = vector.broadcast %34 : vector<1x128xf32> to vector<256x128xf32>
    %36 = arith.mulf %33, %35 : vector<256x128xf32>
    %cst_24 = arith.constant dense<0.000000e+00> : vector<256xf32>
    %37 = vector.multi_reduction <add>, %36, %cst_24 [1] : vector<256x128xf32> to vector<256xf32>
    %38 = vector.shape_cast %37 : vector<256xf32> to vector<256x1xf32>
    %c0_25 = arith.constant 0 : index
    %39 = memref.load %arg1[%c0_25] : memref<1xf32, #tpu.memory_space<smem>>
    %40 = vector.broadcast %39 : f32 to vector<256x1xf32>
    %41 = arith.addf %38, %40 : vector<256x1xf32>
    %42 = arith.extf %2 : vector<256x4xbf16> to vector<256x4xf32>
    %43 = vector.broadcast %41 : vector<256x1xf32> to vector<256x4xf32>
    %44 = arith.mulf %43, %42 : vector<256x4xf32>
    %45 = vector.shape_cast %44 : vector<256x4xf32> to vector<16x16x4xf32>
    %cst_26 = arith.constant dense<0.000000e+00> : vector<16x4xf32>
    %46 = vector.multi_reduction <add>, %45, %cst_26 [1] : vector<16x16x4xf32> to vector<16x4xf32>
    %c0_27 = arith.constant 0 : index
    %c0_28 = arith.constant 0 : index
    %47 = vector.load %arg11[%c0_27, %c0_28] : memref<16x4xf32, #tpu.memory_space<vmem>>, vector<16x4xf32>
    tpu.vector_store %arg11[%c0_27, %c0_28], %46 {strides = array<i32>} : memref<16x4xf32, #tpu.memory_space<vmem>>, vector<16x4xf32>,
    return
  }
  func.func @transform_0(%arg0: i32) -> i32 {
    %c0_i32 = arith.constant 0 : i32
    %c0_i32_0 = arith.constant 0 : i32
    return %c0_i32 : i32
  }
  func.func @transform_1(%arg0: i32) -> (i32, i32, i32) {
    %c0_i32 = arith.constant 0 : i32
    %c0_i32_0 = arith.constant 0 : i32
    %c0_i32_1 = arith.constant 0 : i32
    return %arg0, %c0_i32, %c0_i32_0 : i32, i32, i32
  }
  func.func @transform_2(%arg0: i32) -> (i32, i32, i32) {
    %c0_i32 = arith.constant 0 : i32
    %c0_i32_0 = arith.constant 0 : i32
    %c0_i32_1 = arith.constant 0 : i32
    return %arg0, %c0_i32, %c0_i32_0 : i32, i32, i32
  }
  func.func @transform_3(%arg0: i32) -> (i32, i32) {
    %c0_i32 = arith.constant 0 : i32
    %c0_i32_0 = arith.constant 0 : i32
    %c0_i32_1 = arith.constant 0 : i32
    return %c0_i32, %c0_i32_0 : i32, i32
  }
  func.func @transform_4(%arg0: i32) -> (i32, i32) {
    %c0_i32 = arith.constant 0 : i32
    %c0_i32_0 = arith.constant 0 : i32
    %c0_i32_1 = arith.constant 0 : i32
    return %c0_i32, %c0_i32_0 : i32, i32
  }
  func.func @transform_5(%arg0: i32) -> (i32, i32) {
    %c0_i32 = arith.constant 0 : i32
    %c0_i32_0 = arith.constant 0 : i32
    %c0_i32_1 = arith.constant 0 : i32
    return %c0_i32, %c0_i32_0 : i32, i32
  }
  func.func @transform_6(%arg0: i32) -> (i32, i32) {
    %c0_i32 = arith.constant 0 : i32
    %c0_i32_0 = arith.constant 0 : i32
    %c0_i32_1 = arith.constant 0 : i32
    return %c0_i32, %c0_i32_0 : i32, i32
  }
  func.func @transform_7(%arg0: i32) -> (i32, i32) {
    %c0_i32 = arith.constant 0 : i32
    %c0_i32_0 = arith.constant 0 : i32
    %c0_i32_1 = arith.constant 0 : i32
    return %c0_i32, %c0_i32_0 : i32, i32
  }
  func.func @transform_8(%arg0: i32) -> (i32, i32) {
    %c0_i32 = arith.constant 0 : i32
    %c0_i32_0 = arith.constant 0 : i32
    %c0_i32_1 = arith.constant 0 : i32
    return %c0_i32, %c0_i32_0 : i32, i32
  }
  func.func @transform_9(%arg0: i32) -> (i32, i32) {
    %c0_i32 = arith.constant 0 : i32
    %c0_i32_0 = arith.constant 0 : i32
    %c0_i32_1 = arith.constant 0 : i32
    return %c0_i32, %c0_i32_0 : i32, i32
  }
  func.func @transform_10(%arg0: i32) -> (i32, i32) {
    %c0_i32 = arith.constant 0 : i32
    %c0_i32_0 = arith.constant 0 : i32
    return %arg0, %c0_i32 : i32, i32
  }
}

</mosaic_0001>

<bundles_post_ra>
// kernel: tpu_custom_call.1
= control target key start
LH: loop header
LB: loop body
LE: loop exit
PB: predicated region body
PF: predicated region fallthrough
CT: control target
= control target key end

     0   :  { %vm472_vm0 = vcmask 1041408   ;;  %v88_v0 = vlaneseq  ;;  %vm423_vm1 = vcmask 31744   ;;  %vm2206_vm2 = vcmask 1041409   ;;  %s3810_s4 = inlined_call_operand.vmem [shape: bf16[4,128], index: 4, kind: input, shape index: {}]   ;;  %s3811_s3 = inlined_call_operand.vmem [shape: bf16[4,128], index: 3, kind: input, shape index: {}]   ;;  %s3812_s1 = inlined_call_operand.vmem [shape: bf16[16,1,4], index: 1, kind: input, shape index: {}]   ;;  %s3813_s2 = inlined_call_operand.vmem [shape: bf16[16,16,4], index: 2, kind: input, shape index: {}]   ;;  %s3814_s5 = inlined_call_operand.vmem [shape: bf16[4,128], index: 5, kind: input, shape index: {}]   ;;  %s3815_s7 = inlined_call_operand.vmem [shape: bf16[128,128], index: 7, kind: input, shape index: {}]   ;;  %s3816_s6 = inlined_call_operand.vmem [shape: f32[1,128], index: 6, kind: input, shape index: {}]   ;;  %s3817_s8 = inlined_call_operand.vmem [shape: f32[1,128], index: 8, kind: input, shape index: {}]   ;;  %s3818_s9 = inlined_call_operand.vmem [shape: f32[1,128], index: 9, kind: input, shape index: {}]   ;;  %s3819_s0 = inlined_call_operand.<no memory space> [shape: f32[1], index: 0, kind: input, shape index: {}]   ;;  %s3820_s10 = inlined_call_operand.vmem [shape: f32[16,4], index: 10, kind: output, shape index: {}]  }
   0x1   :  { %v342_v1 = vld [vmem:[%s3810_s4] sm:$0x3]  ;;  %v38_v6 = vld [vmem:[%s3813_s2 + $0x4] sm:$0xf]  ;;  %v39_v12 = vld [vmem:[%s3813_s2 + $0x8] sm:$0xf] }
   0x2   :  { %v341_v2 = vld [vmem:[%s3811_s3] sm:$0x3]  ;;  %2647 = vmatprep.subr.msk.bf16.mxu0 %vm472_vm0, %v342_v1  ;;  %v474_v4 = vsel %vm472_vm0, %v342_v1, 0  ;;  %v89_v9 = vshrl.u32 %v88_v0, 7  ;;  %v40_v13 = vld [vmem:[%s3813_s2 + $0xc] sm:$0xf] }
   0x3   :  { %v37_v3 = vld [vmem:[%s3813_s2] sm:$0xf]  ;;  %2648 = vmatprep.subr.msk.bf16.mxu1 %vm472_vm0, %v341_v2  ;;  %v766_v5 = vsel %vm472_vm0, %v341_v2, 0  ;;  %2498 = vmatpush3.bf16.msra.mxu0 %v474_v4  ;;  %v2300_v17 = vcombine.low %v39_v12, %v40_v13  ;;  %v41_v18 = vld [vmem:[%s3813_s2 + $0x10] sm:$0xf]  ;;  %vm2208_vm3 = vcmask 1042434  }
   0x4   :  { %v69_v7 = vld [vmem:[%s3812_s1] sm:$0x1]  ;;  %2532 = vmatpush3.bf16.msra.mxu1 %v766_v5  ;;  %v2299_v10 = vcombine.low %v37_v3, %v38_v6  ;;  %v70_v14 = vld [vmem:[%s3812_s1 + $0x1] sm:$0x1]  ;;  %v3049_v15 = vsub.s32 0, %v89_v9  ;;  %vm2210_vm4 = vcmask 1043459  }
   0x5   :  { %v86_v8 = vpack.i.b16 %v69_v7, %v69_v7  ;;  %v929_v11 = vld [vmem:[%s3814_s5] sm:$0x3]  ;;  %v93_v16 = vpack.i.b16 %v70_v14, %v70_v14  ;;  %v42_v19 = vld [vmem:[%s3813_s2 + $0x14] sm:$0xf]  ;;  %v71_v20 = vld [vmem:[%s3812_s1 + $0x2] sm:$0x1] }
   0x6   :  { %2649 = vmatprep.subr.msk.bf16.mxu0 %vm472_vm0, %v929_v11  ;;  %2533 = vmatprep.mubr.msk.bf16.mxu1 %vm423_vm1, %v2299_v10  ;;  %v2301_v21 = vcombine.low %v41_v18, %v42_v19  ;;  %v43_v22 = vld [vmem:[%s3813_s2 + $0x18] sm:$0xf]  ;;  %v44_v23 = vld [vmem:[%s3813_s2 + $0x1c] sm:$0xf]  ;;  %v100_v26 = vpack.i.b16 %v71_v20, %v71_v20  ;;  %v72_v27 = vld [vmem:[%s3812_s1 + $0x3] sm:$0x1] }
   0x7   :  { %v3068_v24 = vrot.slane %v86_v8, %v3049_v15  ;;  %v3071_v25 = vrot.slane %v93_v16, %v3049_v15  ;;  %2534 = vmatmul.mubr.msk.bf16.vlgmr.msra.gmra.mxu1 %vm423_vm1, %v2300_v17  ;;  %v45_v28 = vld [vmem:[%s3813_s2 + $0x20] sm:$0xf]  ;;  %v46_v29 = vld [vmem:[%s3813_s2 + $0x24] sm:$0xf]  ;;  %v107_v30 = vpack.i.b16 %v72_v27, %v72_v27  ;;  %v2302_v31 = vcombine.low %v43_v22, %v44_v23  ;;  %v48_v4 = vld [vmem:[%s3813_s2 + $0x2c] sm:$0xf] }
   0x8   :  { %2537 = vmatprep.mubr.msk.bf16.mxu1 %vm423_vm1, %v2301_v21  ;;  %v73_v32 = vld [vmem:[%s3812_s1 + $0x4] sm:$0x1]  ;;  %v2303_v33 = vcombine.low %v45_v28, %v46_v29  ;;  %v74_v38 = vld [vmem:[%s3812_s1 + $0x5] sm:$0x1]  ;;  %v3099_v39 = vrot.slane %v100_v26, %v3049_v15  ;;  %v979_v53 = vsel %vm472_vm0, %v929_v11, 0  ;;  %vm2212_vm5 = vcmask 1044484  }
   0x9   :  { %v2235_v34 = vcombine.low %v3068_v24, %v3068_v24  ;;  %v2236_v35 = vcombine.high %v3068_v24, %v3068_v24  ;;  %v2237_v36 = vcombine.low %v3071_v25, %v3071_v25  ;;  %v2238_v37 = vcombine.high %v3071_v25, %v3071_v25  ;;  %v75_v62 = vld [vmem:[%s3812_s1 + $0x6] sm:$0x1]  ;;  %v76_v2 = vld [vmem:[%s3812_s1 + $0x7] sm:$0x1]  ;;  %v49_v10 = vld [vmem:[%s3813_s2 + $0x30] sm:$0xf] }
   0xa   :  { %v3102_v40 = vrot.slane %v107_v30, %v3049_v15  ;;  %v114_v41 = vpack.i.b16 %v73_v32, %v73_v32  ;;  %v121_v42 = vpack.i.b16 %v74_v38, %v74_v38  ;;  %v2239_v47 = vcombine.low %v3099_v39, %v3099_v39  ;;  %v50_v11 = vld [vmem:[%s3813_s2 + $0x34] sm:$0xf]  ;;  %v53_v32 = vld [vmem:[%s3813_s2 + $0x40] sm:$0xf] }
   0xb   :  { %v309_v43 = vmul.bf16 %v2235_v34, %v37_v3  ;;  %v310_v44 = vmul.bf16 %v2236_v35, %v38_v6  ;;  %v311_v45 = vmul.bf16 %v2237_v36, %v39_v12  ;;  %v312_v46 = vmul.bf16 %v2238_v37, %v40_v13  ;;  %v47_v3 = vld [vmem:[%s3813_s2 + $0x28] sm:$0xf] }
   0xc   :  { %v2240_v48 = vcombine.high %v3099_v39, %v3099_v39  ;;  %v2241_v49 = vcombine.low %v3102_v40, %v3102_v40  ;;  %v2242_v50 = vcombine.high %v3102_v40, %v3102_v40  ;;  %v3114_v54 = vrot.slane %v114_v41, %v3049_v15  ;;  %v77_v6 = vld [vmem:[%s3812_s1 + $0x8] sm:$0x1]  ;;  %v79_v34 = vld [vmem:[%s3812_s1 + $0xa] sm:$0x1] }
   0xd   :  { %v2267_v51 = vcombine.low %v309_v43, %v310_v44  ;;  %v2268_v52 = vcombine.low %v311_v45, %v312_v46  ;;  %v313_v55 = vmul.bf16 %v2239_v47, %v41_v18  ;;  %v3117_v58 = vrot.slane %v121_v42, %v3049_v15 }
   0xe   :  { %v314_v56 = vmul.bf16 %v2240_v48, %v42_v19  ;;  %v315_v57 = vmul.bf16 %v2241_v49, %v43_v22  ;;  %v316_v59 = vmul.bf16 %v2242_v50, %v44_v23  ;;  %v2243_v60 = vcombine.low %v3114_v54, %v3114_v54 }
   0xf   :  { %2499 = vmatprep.mubr.msk.bf16.mxu0 %vm423_vm1, %v2267_v51  ;;  %2538 = vmatmul.mubr.msk.bf16.gmra.mxu1 %vm423_vm1, %v2302_v31  ;;  %v2244_v61 = vcombine.high %v3114_v54, %v3114_v54  ;;  %v128_v5 = vpack.i.b16 %v75_v62, %v75_v62  ;;  %v2245_v8 = vcombine.low %v3117_v58, %v3117_v58  ;;  %v78_v31 = vld [vmem:[%s3812_s1 + $0x9] sm:$0x1]  ;;  %vm2214_vm6 = vcmask 1045509  }
  0x10   :  { %2500 = vmatmul.mubr.msk.bf16.vlgmr.msra.gmra.mxu0 %vm423_vm1, %v2268_v52  ;;  %v2269_v63 = vcombine.low %v313_v55, %v314_v56  ;;  %2541 = vmatprep.mubr.msk.bf16.mxu1 %vm423_vm1, %v2303_v33  ;;  %v317_v0 = vmul.bf16 %v2243_v60, %v45_v28  ;;  %v2270_v7 = vcombine.low %v315_v57, %v316_v59  ;;  %v51_v28 = vld [vmem:[%s3813_s2 + $0x38] sm:$0xf]  ;;  %v54_v33 = vld [vmem:[%s3813_s2 + $0x44] sm:$0xf]  ;;  %v55_v52 = vld [vmem:[%s3813_s2 + $0x48] sm:$0xf] }
  0x11   :  { %2566 = vmatpush3.bf16.msra.mxu0 %v979_v53  ;;  %v318_v1 = vmul.bf16 %v2244_v61, %v46_v29  ;;  %v2304_v9 = vcombine.low %v47_v3, %v48_v4  ;;  %v2246_v12 = vcombine.high %v3117_v58, %v3117_v58  ;;  %v3154_v13 = vrot.slane %v128_v5, %v3049_v15  ;;  %v52_v29 = vld [vmem:[%s3813_s2 + $0x3c] sm:$0xf]  ;;  %v56_v53 = vld [vmem:[%s3813_s2 + $0x4c] sm:$0xf]  ;;  %v80_v56 = vld [vmem:[%s3812_s1 + $0xb] sm:$0x1] }
  0x12   :  { %2503 = vmatprep.mubr.msk.bf16.mxu0 %vm423_vm1, %v2269_v63  ;;  %v2305_v14 = vcombine.low %v49_v10, %v50_v11  ;;  %v135_v16 = vpack.i.b16 %v76_v2, %v76_v2  ;;  %v142_v18 = vpack.i.b16 %v77_v6, %v77_v6  ;;  %v319_v21 = vmul.bf16 %v2245_v8, %v47_v3  ;;  %v57_v57 = vld [vmem:[%s3813_s2 + $0x50] sm:$0xf]  ;;  %v58_v59 = vld [vmem:[%s3813_s2 + $0x54] sm:$0xf]  ;;  %v81_v60 = vld [vmem:[%s3812_s1 + $0xc] sm:$0x1] }
  0x13   :  { %v2271_v17 = vcombine.low %v317_v0, %v318_v1  ;;  %v2247_v19 = vcombine.low %v3154_v13, %v3154_v13  ;;  %v2248_v20 = vcombine.high %v3154_v13, %v3154_v13  ;;  %v320_v22 = vmul.bf16 %v2246_v12, %v48_v4  ;;  %v59_v12 = vld [vmem:[%s3813_s2 + $0x58] sm:$0xf] }
  0x14   :  { %v3164_v23 = vrot.slane %v135_v16, %v3049_v15  ;;  %v3174_v30 = vrot.slane %v142_v18, %v3049_v15  ;;  %v2306_v35 = vcombine.low %v51_v28, %v52_v29  ;;  %v2307_v36 = vcombine.low %v53_v32, %v54_v33  ;;  %v61_v18 = vld [vmem:[%s3813_s2 + $0x60] sm:$0xf] }
  0x15   :  { %v321_v26 = vmul.bf16 %v2247_v19, %v49_v10  ;;  %v322_v27 = vmul.bf16 %v2248_v20, %v50_v11  ;;  %v2272_v37 = vcombine.low %v319_v21, %v320_v22  ;;  %v149_v42 = vpack.i.b16 %v78_v31, %v78_v31  ;;  %v62_v19 = vld [vmem:[%s3813_s2 + $0x64] sm:$0xf]  ;;  %v83_v20 = vld [vmem:[%s3812_s1 + $0xe] sm:$0x1] }
  0x16   :  { %v2249_v38 = vcombine.low %v3164_v23, %v3164_v23  ;;  %v2250_v41 = vcombine.high %v3164_v23, %v3164_v23  ;;  %v2251_v44 = vcombine.low %v3174_v30, %v3174_v30  ;;  %v2252_v45 = vcombine.high %v3174_v30, %v3174_v30 }
  0x17   :  { %2542 = vmatmul.mubr.msk.bf16.gmra.mxu1 %vm423_vm1, %v2304_v9  ;;  %v2273_v43 = vcombine.low %v321_v26, %v322_v27  ;;  %v156_v46 = vpack.i.b16 %v79_v34, %v79_v34  ;;  %v3200_v49 = vrot.slane %v149_v42, %v3049_v15  ;;  %v2308_v61 = vcombine.low %v55_v52, %v56_v53  ;;  %v63_v42 = vld [vmem:[%s3813_s2 + $0x68] sm:$0xf] }
  0x18   :  { %2504 = vmatmul.mubr.msk.bf16.gmra.mxu0 %vm423_vm1, %v2270_v7  ;;  %2545 = vmatprep.mubr.msk.bf16.mxu1 %vm423_vm1, %v2305_v14  ;;  %v323_v47 = vmul.bf16 %v2249_v38, %v51_v28  ;;  %v324_v48 = vmul.bf16 %v2250_v41, %v52_v29  ;;  %v325_v50 = vmul.bf16 %v2251_v44, %v53_v32  ;;  %v60_v14 = vld [vmem:[%s3813_s2 + $0x5c] sm:$0xf]  ;;  %v84_v44 = vld [vmem:[%s3812_s1 + $0xf] sm:$0x1]  ;;  %vm2216_vm7 = vcmask 1046534  }
  0x19   :  { %2507 = vmatprep.mubr.msk.bf16.mxu0 %vm423_vm1, %v2271_v17  ;;  %v326_v51 = vmul.bf16 %v2252_v45, %v54_v33  ;;  %v3210_v55 = vrot.slane %v156_v46, %v3049_v15  ;;  %v2309_v62 = vcombine.low %v57_v57, %v58_v59  ;;  %v2253_v0 = vcombine.low %v3200_v49, %v3200_v49  ;;  %v82_v17 = vld [vmem:[%s3812_s1 + $0xd] sm:$0x1]  ;;  %v65_v46 = vld [vmem:[%s3813_s2 + $0x70] sm:$0xf] }
  0x1a   :  { %v2274_v63 = vcombine.low %v323_v47, %v324_v48  ;;  %v2254_v1 = vcombine.high %v3200_v49, %v3200_v49  ;;  %v163_v2 = vpack.i.b16 %v80_v56, %v80_v56  ;;  %v170_v6 = vpack.i.b16 %v81_v60, %v81_v60  ;;  %v64_v45 = vld [vmem:[%s3813_s2 + $0x6c] sm:$0xf]  ;;  %v66_v47 = vld [vmem:[%s3813_s2 + $0x74] sm:$0xf] }
  0x1b   :  { %v2275_v3 = vcombine.low %v325_v50, %v326_v51  ;;  %v2255_v4 = vcombine.low %v3210_v55, %v3210_v55  ;;  %v2256_v5 = vcombine.high %v3210_v55, %v3210_v55  ;;  %v327_v7 = vmul.bf16 %v2253_v0, %v55_v52 }
  0x1c   :  { %v328_v8 = vmul.bf16 %v2254_v1, %v56_v53  ;;  %v3236_v9 = vrot.slane %v163_v2, %v3049_v15  ;;  %v3246_v16 = vrot.slane %v170_v6, %v3049_v15  ;;  %v2310_v21 = vcombine.low %v59_v12, %v60_v14  ;;  %v67_v2 = vld [vmem:[%s3813_s2 + $0x78] sm:$0xf] }
  0x1d   :  { %v329_v10 = vmul.bf16 %v2255_v4, %v57_v57  ;;  %v330_v11 = vmul.bf16 %v2256_v5, %v58_v59  ;;  %v2311_v22 = vcombine.low %v61_v18, %v62_v19  ;;  %v177_v29 = vpack.i.b16 %v82_v17, %v82_v17 }
  0x1e   :  { %v2276_v26 = vcombine.low %v327_v7, %v328_v8  ;;  %v2257_v27 = vcombine.low %v3236_v9, %v3236_v9  ;;  %v2258_v28 = vcombine.high %v3236_v9, %v3236_v9  ;;  %v2259_v32 = vcombine.low %v3246_v16, %v3246_v16 }
  0x1f   :  { %2546 = vmatmul.mubr.msk.bf16.gmra.mxu1 %vm423_vm1, %v2306_v35  ;;  %v2277_v31 = vcombine.low %v329_v10, %v330_v11  ;;  %v2260_v33 = vcombine.high %v3246_v16, %v3246_v16  ;;  %v184_v34 = vpack.i.b16 %v83_v20, %v83_v20  ;;  %v2312_v48 = vcombine.low %v63_v42, %v64_v45 }
  0x20   :  { %2508 = vmatmul.mubr.msk.bf16.gmra.mxu0 %vm423_vm1, %v2272_v37  ;;  %2549 = vmatprep.mubr.msk.bf16.mxu1 %vm423_vm1, %v2307_v36  ;;  %v331_v35 = vmul.bf16 %v2257_v27, %v59_v12  ;;  %v332_v36 = vmul.bf16 %v2258_v28, %v60_v14  ;;  %v182_v37 = vrot.slane %v177_v29, %v3049_v15  ;;  %vm2218_vm8 = vcmask 1047559  }
  0x21   :  { %2511 = vmatprep.mubr.msk.bf16.mxu0 %vm423_vm1, %v2273_v43  ;;  %v333_v38 = vmul.bf16 %v2259_v32, %v61_v18  ;;  %v334_v41 = vmul.bf16 %v2260_v33, %v62_v19  ;;  %v189_v43 = vrot.slane %v184_v34, %v3049_v15  ;;  %v2313_v50 = vcombine.low %v65_v46, %v66_v47 }
  0x22   :  { %v2278_v51 = vcombine.low %v331_v35, %v332_v36  ;;  %v2261_v52 = vcombine.low %v182_v37, %v182_v37  ;;  %v2262_v53 = vcombine.high %v182_v37, %v182_v37  ;;  %v191_v56 = vpack.i.b16 %v84_v44, %v84_v44 }
  0x23   :  { %v2279_v57 = vcombine.low %v333_v38, %v334_v41  ;;  %v2263_v59 = vcombine.low %v189_v43, %v189_v43  ;;  %v2264_v60 = vcombine.high %v189_v43, %v189_v43 }
  0x25   :  { %v337_v0 = vmul.bf16 %v2263_v59, %v65_v46  ;;  %v338_v1 = vmul.bf16 %v2264_v60, %v66_v47 }
  0x27   :  { %2550 = vmatmul.mubr.msk.bf16.gmra.mxu1 %vm423_vm1, %v2308_v61  ;;  %v335_v61 = vmul.bf16 %v2261_v52, %v63_v42  ;;  %v2281_v8 = vcombine.low %v337_v0, %v338_v1 }
  0x28   :  { %2512 = vmatmul.mubr.msk.bf16.gmra.mxu0 %vm423_vm1, %v2274_v63  ;;  %2553 = vmatprep.mubr.msk.bf16.mxu1 %vm423_vm1, %v2309_v62  ;;  %v336_v62 = vmul.bf16 %v2262_v53, %v64_v45  ;;  %v196_v63 = vrot.slane %v191_v56, %v3049_v15 }
  0x29   :  { %2515 = vmatprep.mubr.msk.bf16.mxu0 %vm423_vm1, %v2275_v3  ;;  %v68_v3 = vld [vmem:[%s3813_s2 + $0x7c] sm:$0xf] }
  0x2a   :  { %v2314_v4 = vcombine.low %v67_v2, %v68_v3  ;;  %v2280_v5 = vcombine.low %v335_v61, %v336_v62  ;;  %v2265_v6 = vcombine.low %v196_v63, %v196_v63  ;;  %v2266_v7 = vcombine.high %v196_v63, %v196_v63 }
  0x2c   :  { %v339_v15 = vmul.bf16 %v2265_v6, %v67_v2  ;;  %v340_v10 = vmul.bf16 %v2266_v7, %v68_v3  ;;  %v3434_v7 = vld [vmem:[%s3816_s6] ss:$0 sm:$0xff] }
  0x2e   :  { %v2282_v11 = vcombine.low %v339_v15, %v340_v10 }
  0x2f   :  { %2554 = vmatmul.mubr.msk.bf16.gmra.mxu1 %vm423_vm1, %v2310_v21 }
  0x30   :  { %2516 = vmatmul.mubr.msk.bf16.gmra.mxu0 %vm423_vm1, %v2276_v26  ;;  %2557 = vmatprep.mubr.msk.bf16.mxu1 %vm423_vm1, %v2311_v22 }
  0x31   :  { %2519 = vmatprep.mubr.msk.bf16.mxu0 %vm423_vm1, %v2277_v31 }
  0x37   :  { %2558 = vmatmul.mubr.msk.bf16.gmra.mxu1 %vm423_vm1, %v2312_v48 }
  0x38   :  { %2520 = vmatmul.mubr.msk.bf16.gmra.mxu0 %vm423_vm1, %v2278_v51  ;;  %2561 = vmatprep.mubr.msk.bf16.mxu1 %vm423_vm1, %v2313_v50 }
  0x39   :  { %2523 = vmatprep.mubr.msk.bf16.mxu0 %vm423_vm1, %v2279_v57 }
  0x3f   :  { %2562 = vmatmul.mubr.msk.bf16.gmra.mxu1 %vm423_vm1, %v2314_v4 }
  0x40   :  { %2524 = vmatmul.mubr.msk.bf16.gmra.mxu0 %vm423_vm1, %v2280_v5 }
  0x41   :  { %2527 = vmatprep.mubr.msk.bf16.mxu0 %vm423_vm1, %v2281_v8 }
  0x48   :  { %2528 = vmatmul.mubr.msk.bf16.gmra.mxu0 %vm423_vm1, %v2282_v11 }
  0x49   :  { %2567 = vmatprep.mubr.msk.bf16.mxu0 %vm423_vm1, %v3068_v24  ;;  %v2666_v24 = vld [vmem:[%s3815_s7 + $0x38] sm:$0xff]  }
  0x4a   :  { %2599 = vmatprep.subr.bf16.mxu1 %v2666_v24 }
  0x4b   :  { %2600 = vmatpush3.bf16.msra.mxu1 %v2666_v24 }
  0x50   :  { %2568 = vmatmul.mubr.msk.bf16.vlgmr.msra.gmra.mxu0 %vm423_vm1, %v3071_v25  ;;  %v2667_v25 = vld [vmem:[%s3815_s7 + $0x30] sm:$0xff]  }
  0x51   :  { %2571 = vmatprep.mubr.msk.bf16.mxu0 %vm423_vm1, %v3099_v39  ;;  %2601 = vmatprep.subr.bf16.mxu1 %v2667_v25  ;;  %v2668_v39 = vld [vmem:[%s3815_s7 + $0x28] sm:$0xff]  }
  0x52   :  { %2602 = vmatpush3.bf16.msra.mxu1 %v2667_v25 }
  0x53   :  { %2603 = vmatprep.subr.bf16.mxu1 %v2668_v39 }
  0x56   :  { %2604 = vmatpush3.bf16.msra.mxu1 %v2668_v39 }
  0x58   :  { %2572 = vmatmul.mubr.msk.bf16.gmra.mxu0 %vm423_vm1, %v3102_v40  ;;  %v2669_v40 = vld [vmem:[%s3815_s7 + $0x20] sm:$0xff]  }
  0x59   :  { %2575 = vmatprep.mubr.msk.bf16.mxu0 %vm423_vm1, %v3114_v54  ;;  %2605 = vmatprep.subr.bf16.mxu1 %v2669_v40  ;;  %v2670_v54 = vld [vmem:[%s3815_s7 + $0x18] sm:$0xff]  }
  0x5a   :  { %2606 = vmatpush3.bf16.msra.mxu1 %v2669_v40 }
  0x5b   :  { %2607 = vmatprep.subr.bf16.mxu1 %v2670_v54 }
  0x5e   :  { %2608 = vmatpush3.bf16.msra.mxu1 %v2670_v54 }
  0x60   :  { %2576 = vmatmul.mubr.msk.bf16.gmra.mxu0 %vm423_vm1, %v3117_v58  ;;  %v2671_v58 = vld [vmem:[%s3815_s7 + $0x10] sm:$0xff]  }
  0x61   :  { %2579 = vmatprep.mubr.msk.bf16.mxu0 %vm423_vm1, %v3154_v13  ;;  %2609 = vmatprep.subr.bf16.mxu1 %v2671_v58  ;;  %v2672_v13 = vld [vmem:[%s3815_s7 + $0x8] sm:$0xff]  }
  0x62   :  { %2610 = vmatpush3.bf16.msra.mxu1 %v2671_v58 }
  0x63   :  { %2611 = vmatprep.subr.bf16.mxu1 %v2672_v13 }
  0x66   :  { %2612 = vmatpush3.bf16.msra.mxu1 %v2672_v13 }
  0x68   :  { %2580 = vmatmul.mubr.msk.bf16.gmra.mxu0 %vm423_vm1, %v3164_v23  ;;  %v2673_v23 = vld [vmem:[%s3815_s7] sm:$0xff]  }
  0x69   :  { %2583 = vmatprep.mubr.msk.bf16.mxu0 %vm423_vm1, %v3174_v30  ;;  %2613 = vmatprep.subr.bf16.mxu1 %v2673_v23 }
  0x6a   :  { %2614 = vmatpush3.bf16.msra.mxu1 %v2673_v23 }
  0x70   :  { %2584 = vmatmul.mubr.msk.bf16.gmra.mxu0 %vm423_vm1, %v3200_v49 }
  0x71   :  { %2587 = vmatprep.mubr.msk.bf16.mxu0 %vm423_vm1, %v3210_v55 }
  0x78   :  { %2588 = vmatmul.mubr.msk.bf16.gmra.mxu0 %vm423_vm1, %v3236_v9 }
  0x79   :  { %2591 = vmatprep.mubr.msk.bf16.mxu0 %vm423_vm1, %v3246_v16 }
  0x80   :  { %2592 = vmatmul.mubr.msk.bf16.gmra.mxu0 %vm423_vm1, %v182_v37 }
  0x81   :  { %2595 = vmatprep.mubr.msk.bf16.mxu0 %vm423_vm1, %v189_v43 }
  0x88   :  { %2596 = vmatmul.mubr.msk.bf16.gmra.mxu0 %vm423_vm1, %v196_v63 }
  0xc7   :  { %v2535_v30 = vpop.f32.mrf.mxu1 }
  0xc9   :  { %v802_v55 = vpop.f32.mrf.mxu1 }
  0xcb   :  { %v2536_v14 = vpop.f32.mrf.mxu1 }
  0xcd   :  { %v805_v18 = vpop.f32.mrf.mxu1 }
  0xcf   :  { %v2539_v21 = vpop.f32.mrf.mxu1 }
  0xd0   :  { %v2501_v49 = vpop.f32.mrf.mxu0 }
  0xd1   :  { %v818_v27 = vpop.f32.mrf.mxu1  ;;  %v811_v5 = vadd.f32 %v2535_v30, %v2501_v49 }
  0xd2   :  { %v510_v9 = vpop.f32.mrf.mxu0 }
  0xd3   :  { %v2540_v31 = vpop.f32.mrf.mxu1  ;;  %v803_v8 = vadd.f32 %v802_v55, %v510_v9 }
  0xd4   :  { %v2502_v12 = vpop.f32.mrf.mxu0 }
  0xd5   :  { %v3373_v34 = vpop.f32.mrf.mxu1  ;;  %v814_v24 = vadd.f32 %v2536_v14, %v2502_v12 }
  0xd6   :  { %v513_v16 = vpop.f32.mrf.mxu0 }
  0xd7   :  { %v3379_v37 = vpop.f32.mrf.mxu1  ;;  %v806_v54 = vadd.f32 %v805_v18, %v513_v16 }
  0xd8   :  { %v2505_v17 = vpop.f32.mrf.mxu0 }
  0xd9   :  { %v3385_v42 = vpop.f32.mrf.mxu1  ;;  %v827_v49 = vadd.f32 %v2539_v21, %v2505_v17 }
  0xda   :  { %v3357_v19 = vpop.f32.mrf.mxu0 }
  0xdb   :  { %v3391_v45 = vpop.f32.mrf.mxu1  ;;  %v819_v12 = vadd.f32 %v818_v27, %v3357_v19 }
  0xdc   :  { %v3359_v20 = vpop.f32.mrf.mxu0 }
  0xdd   :  { %v3397_v48 = vpop.f32.mrf.mxu1 }
  0xde   :  { %v3361_v22 = vpop.f32.mrf.mxu0 }
  0xdf   :  { %v3403_v52 = vpop.f32.mrf.mxu1 }
  0xe0   :  { %v3363_v26 = vpop.f32.mrf.mxu0 }
  0xe1   :  { %v3409_v57 = vpop.f32.mrf.mxu1 }
  0xe2   :  { %v3365_v28 = vpop.f32.mrf.mxu0 }
  0xe3   :  { %v3415_v61 = vpop.f32.mrf.mxu1 }
  0xe4   :  { %v3367_v29 = vpop.f32.mrf.mxu0 }
  0xe5   :  { %v3421_v0 = vpop.f32.mrf.mxu1 }
  0xe6   :  { %v3369_v32 = vpop.f32.mrf.mxu0 }
  0xe7   :  { %v3427_v3 = vpop.f32.mrf.mxu1 }
  0xe8   :  { %v3371_v33 = vpop.f32.mrf.mxu0 }
  0xe9   :  { %v3436_v15 = vpop.f32.mrf.mxu1 }
  0xea   :  { %v3375_v35 = vpop.f32.mrf.mxu0 }
  0xeb   :  { %v3439_v58 = vpop.f32.mrf.mxu1 }
  0xec   :  { %v3377_v36 = vpop.f32.mrf.mxu0 }
  0xee   :  { %v3381_v38 = vpop.f32.mrf.mxu0 }
  0xf0   :  { %v3383_v41 = vpop.f32.mrf.mxu0 }
  0xf2   :  { %v3387_v43 = vpop.f32.mrf.mxu0 }
  0xf4   :  { %v3389_v44 = vpop.f32.mrf.mxu0 }
  0xf6   :  { %v3393_v46 = vpop.f32.mrf.mxu0 }
  0xf8   :  { %v3395_v47 = vpop.f32.mrf.mxu0 }
  0xfa   :  { %v3399_v50 = vpop.f32.mrf.mxu0 }
  0xfc   :  { %v3401_v51 = vpop.f32.mrf.mxu0 }
  0xfe   :  { %v3405_v53 = vpop.f32.mrf.mxu0 }
 0x100   :  { %v3407_v56 = vpop.f32.mrf.mxu0 }
 0x102   :  { %v3411_v59 = vpop.f32.mrf.mxu0 }
 0x104   :  { %v3413_v60 = vpop.f32.mrf.mxu0 }
 0x106   :  { %v3417_v62 = vpop.f32.mrf.mxu0 }
 0x108   :  { %v3419_v63 = vpop.f32.mrf.mxu0 }
 0x10a   :  { %v3423_v1 = vpop.f32.mrf.mxu0 }
 0x10c   :  { %v3425_v2 = vpop.f32.mrf.mxu0 }
 0x10e   :  { %v3429_v4 = vpop.f32.mrf.mxu0 }
 0x10f   :  { %3821 = vst [vmem:[#allocation3_spill] sm:$0xff] %v3429_v4 }
 0x110   :  { %v2569_v6 = vpop.f32.mrf.mxu0 }
 0x111   :  { %v1144_v10 = vadd.f32 %v2569_v6, %v811_v5  ;;  %v3444_v6 = vpop.f32.mrf.mxu1 }
 0x112   :  { %v1015_v11 = vpop.f32.mrf.mxu0 }
 0x113   :  { %v1183_v25 = vadd.f32 %v3434_v7, %v1144_v10  ;;  %v1142_v39 = vadd.f32 %v1015_v11, %v803_v8  ;;  %v830_v10 = vadd.f32 %v2540_v31, %v3359_v20  ;;  %v3451_v27 = vpop.f32.mrf.mxu1  ;;  %v843_v20 = vadd.f32 %v3379_v37, %v3363_v26 }
 0x114   :  { %v2570_v40 = vpop.f32.mrf.mxu0 }
 0x115   :  { %v2350_v13 = vmul.f32 -1.442695, %v1183_v25  ;;  %v1181_v23 = vadd.f32 %v3434_v7, %v1142_v39  ;;  %v1145_v30 = vadd.f32 %v2570_v40, %v814_v24 }
 0x116   :  { %v1018_v4 = vpop.f32.mrf.mxu0 }
 0x117   :  { %2674 = vpow2.f32 %v2350_v13  ;;  %v2348_v55 = vmul.f32 -1.442695, %v1181_v23  ;;  %v1184_v9 = vadd.f32 %v3434_v7, %v1145_v30  ;;  %v1143_v5 = vadd.f32 %v1018_v4, %v806_v54  ;;  %v3459_v30 = vpop.f32.mrf.mxu1 }
 0x118   :  { %v2573_v14 = vpop.f32.mrf.mxu0  ;;  %v822_v4 = vadd.f32 %v3373_v34, %v3361_v22  ;;  %v835_v22 = vadd.f32 %v3385_v42, %v3365_v28  ;;  %v838_v28 = vadd.f32 %v3397_v48, %v3369_v32 }
 0x119   :  { %2676 = vpow2.f32 %v2348_v55  ;;  %v2351_v16 = vmul.f32 -1.442695, %v1184_v9  ;;  %v1182_v18 = vadd.f32 %v3434_v7, %v1143_v5  ;;  %v1148_v8 = vadd.f32 %v2573_v14, %v827_v49 }
 0x11a   :  { %v1031_v11 = vpop.f32.mrf.mxu0 }
 0x11b   :  { %2678 = vpow2.f32 %v2351_v16  ;;  %v2349_v17 = vmul.f32 -1.442695, %v1182_v18  ;;  %v1187_v21 = vadd.f32 %v3434_v7, %v1148_v8  ;;  %v1146_v24 = vadd.f32 %v1031_v11, %v819_v12  ;;  %v3467_v18 = vpop.f32.mrf.mxu1 }
 0x11c   :  { %v2574_v19 = vpop.f32.mrf.mxu0  ;;  %v846_v16 = vadd.f32 %v3391_v45, %v3367_v29 }
 0x11d   :  { %2680 = vpow2.f32 %v2349_v17  ;;  %v2354_v25 = vmul.f32 -1.442695, %v1187_v21  ;;  %v1185_v39 = vadd.f32 %v3434_v7, %v1146_v24  ;;  %v1149_v40 = vadd.f32 %v2574_v19, %v830_v10 }
 0x11e   :  { %v1034_v31 = vpop.f32.mrf.mxu0  ;;  %v859_v21 = vadd.f32 %v3403_v52, %v3371_v33  ;;  %v851_v33 = vadd.f32 %v3409_v57, %v3375_v35  ;;  %v862_v52 = vadd.f32 %v3415_v61, %v3377_v36 }
 0x11f   :  { %2682 = vpow2.f32 %v2354_v25  ;;  %v2352_v54 = vmul.f32 -1.442695, %v1185_v39  ;;  %v1188_v13 = vadd.f32 %v3434_v7, %v1149_v40  ;;  %v1147_v23 = vadd.f32 %v1034_v31, %v822_v4  ;;  %v3473_v39 = vpop.f32.mrf.mxu1 }
 0x120   :  { %v2577_v34 = vpop.f32.mrf.mxu0 }
 0x121   :  { %2684 = vpow2.f32 %v2352_v54  ;;  %v2355_v49 = vmul.f32 -1.442695, %v1188_v13  ;;  %v1186_v55 = vadd.f32 %v3434_v7, %v1147_v23  ;;  %v1152_v9 = vadd.f32 %v2577_v34, %v843_v20 }
 0x122   :  { %v1047_v5 = vpop.f32.mrf.mxu0 }
 0x123   :  { %2686 = vpow2.f32 %v2355_v49  ;;  %v2353_v26 = vmul.f32 -1.442695, %v1186_v55  ;;  %v1191_v37 = vadd.f32 %v3434_v7, %v1152_v9  ;;  %v1150_v12 = vadd.f32 %v1047_v5, %v835_v22 }
 0x124   :  { %v2675_v14 = vpop.eup %2674  ;;  %v2578_v42 = vpop.f32.mrf.mxu0  ;;  %v854_v9 = vadd.f32 %v3421_v0, %v3381_v38  ;;  %v875_v0 = vadd.f32 %v3427_v3, %v3383_v41 }
 0x125   :  { %v1311_v8 = vadd.f32 1.0, %v2675_v14  ;;  %2688 = vpow2.f32 %v2353_v26  ;;  %v2358_v10 = vmul.f32 -1.442695, %v1191_v37  ;;  %v1189_v11 = vadd.f32 %v3434_v7, %v1150_v12  ;;  %v3483_v37 = vpop.f32.mrf.mxu1 }
 0x126   :  { %v2677_v17 = vpop.eup %2676  ;;  %v1153_v24 = vadd.f32 %v2578_v42, %v846_v16  ;;  %v1050_v4 = vpop.f32.mrf.mxu0 }
 0x127   :  { %2690 = vrcp.f32 %v1311_v8  ;;  %v1309_v19 = vadd.f32 1.0, %v2677_v17  ;;  %v2356_v29 = vmul.f32 -1.442695, %v1189_v11  ;;  %v1151_v45 = vadd.f32 %v1050_v4, %v838_v28  ;;  %v3491_v17 = vpop.f32.mrf.mxu1 }
 0x128   :  { %v2679_v25 = vpop.eup %2678  ;;  %2692 = vpow2.f32 %v2358_v10  ;;  %v1192_v32 = vadd.f32 %v3434_v7, %v1153_v24  ;;  %v2581_v48 = vpop.f32.mrf.mxu0  ;;  %v867_v8 = vadd.f32 %v3436_v15, %v3387_v43 }
 0x129   :  { %2694 = vrcp.f32 %v1309_v19  ;;  %v1312_v40 = vadd.f32 1.0, %v2679_v25  ;;  %v1190_v20 = vadd.f32 %v3434_v7, %v1151_v45  ;;  %v1156_v31 = vadd.f32 %v2581_v48, %v859_v21 }
 0x12a   :  { %v2681_v54 = vpop.eup %2680  ;;  %2696 = vpow2.f32 %v2356_v29  ;;  %v2359_v13 = vmul.f32 -1.442695, %v1192_v32  ;;  %v1063_v23 = vpop.f32.mrf.mxu0  ;;  %v878_v29 = vadd.f32 %v3439_v58, %v3389_v44 }
 0x12b   :  { %2698 = vrcp.f32 %v1312_v40  ;;  %v1310_v22 = vadd.f32 1.0, %v2681_v54  ;;  %v2357_v34 = vmul.f32 -1.442695, %v1190_v20  ;;  %v1195_v49 = vadd.f32 %v3434_v7, %v1156_v31  ;;  %v3501_v31 = vpop.f32.mrf.mxu1 }
 0x12c   :  { %v2683_v55 = vpop.eup %2682  ;;  %2700 = vpow2.f32 %v2359_v13  ;;  %v1154_v5 = vadd.f32 %v1063_v23, %v851_v33  ;;  %v2582_v26 = vpop.f32.mrf.mxu0  ;;  %v870_v20 = vadd.f32 %v3444_v6, %v3393_v46  ;;  %v883_v6 = vadd.f32 %v3459_v30, %v3399_v50 }
 0x12d   :  { %2702 = vrcp.f32 %v1310_v22  ;;  %v1315_v35 = vadd.f32 1.0, %v2683_v55  ;;  %v2362_v36 = vmul.f32 -1.442695, %v1195_v49  ;;  %v1157_v57 = vadd.f32 %v2582_v26, %v862_v52 }
 0x12e   :  { %v2685_v61 = vpop.eup %2684  ;;  %2704 = vpow2.f32 %v2357_v34  ;;  %v1193_v12 = vadd.f32 %v3434_v7, %v1154_v5  ;;  %v1066_v14 = vpop.f32.mrf.mxu0  ;;  %v891_v22 = vadd.f32 %v3451_v27, %v3395_v47  ;;  %v894_v27 = vadd.f32 %v3467_v18, %v3401_v51 }
 0x12f   :  { %2706 = vrcp.f32 %v1315_v35  ;;  %v1313_v16 = vadd.f32 1.0, %v2685_v61  ;;  %v1196_v28 = vadd.f32 %v3434_v7, %v1157_v57  ;;  %v1155_v42 = vadd.f32 %v1066_v14, %v854_v9  ;;  %v3509_v35 = vpop.f32.mrf.mxu1 }
 0x130   :  { %v2687_v38 = vpop.eup %2686  ;;  %2708 = vpow2.f32 %v2362_v36  ;;  %v2360_v10 = vmul.f32 -1.442695, %v1193_v12  ;;  %v2585_v11 = vpop.f32.mrf.mxu0 }
 0x131   :  { %2710 = vrcp.f32 %v1313_v16  ;;  %v1316_v21 = vadd.f32 1.0, %v2687_v38  ;;  %v2363_v24 = vmul.f32 -1.442695, %v1196_v28  ;;  %v1194_v4 = vadd.f32 %v3434_v7, %v1155_v42 }
 0x132   :  { %v2689_v19 = vpop.eup %2688  ;;  %2712 = vpow2.f32 %v2360_v10  ;;  %v1160_v45 = vadd.f32 %v2585_v11, %v875_v0  ;;  %v1079_v41 = vpop.f32.mrf.mxu0  ;;  %v886_v0 = vadd.f32 %v3473_v39, %v3405_v53 }
 0x133   :  { %2714 = vrcp.f32 %v1316_v21  ;;  %v1314_v3 = vadd.f32 1.0, %v2689_v19  ;;  %v2361_v43 = vmul.f32 -1.442695, %v1194_v4  ;;  %v1158_v15 = vadd.f32 %v1079_v41, %v867_v8  ;;  %v2563_v11 = vpop.f32.mrf.mxu1 }
 0x134   :  { %v3496_v25 = vpop.eup %2690  ;;  %2716 = vpow2.f32 %v2363_v24  ;;  %v1199_v32 = vadd.f32 %v3434_v7, %v1160_v45  ;;  %v2586_v48 = vpop.f32.mrf.mxu0 }
 0x135   :  { %v2693_v40 = vpop.eup %2692  ;;  %2718 = vrcp.f32 %v1314_v3  ;;  %v1197_v44 = vadd.f32 %v3434_v7, %v1158_v15  ;;  %v1161_v58 = vadd.f32 %v2586_v48, %v878_v29  ;;  %v907_v29 = vadd.f32 %v3483_v37, %v3407_v56  ;;  %v914_v56 = vpop.f32.mrf.mxu1 }
 0x136   :  { %v2695_v54 = vpop.eup %2694  ;;  %v1319_v33 = vadd.f32 1.0, %v2693_v40  ;;  %2720 = vpow2.f32 %v2361_v43  ;;  %v2366_v52 = vmul.f32 -1.442695, %v1199_v32  ;;  %v1082_v13 = vpop.f32.mrf.mxu0 }
 0x137   :  { %v2697_v23 = vpop.eup %2696  ;;  %v2364_v34 = vmul.f32 -1.442695, %v1197_v44  ;;  %v1200_v49 = vadd.f32 %v3434_v7, %v1161_v58  ;;  %v1159_v55 = vadd.f32 %v1082_v13, %v870_v20 }
 0x138   :  { %v2699_v46 = vpop.eup %2698  ;;  %2722 = vrcp.f32 %v1319_v33  ;;  %v1317_v9 = vadd.f32 1.0, %v2697_v23  ;;  %v2589_v5 = vpop.f32.mrf.mxu0 }
 0x139   :  { %v2701_v26 = vpop.eup %2700  ;;  %2724 = vpow2.f32 %v2366_v52  ;;  %v2367_v36 = vmul.f32 -1.442695, %v1200_v49  ;;  %v1198_v57 = vadd.f32 %v3434_v7, %v1159_v55  ;;  %v1164_v61 = vadd.f32 %v2589_v5, %v891_v22 }
 0x13a   :  { %v2703_v47 = vpop.eup %2702  ;;  %2726 = vrcp.f32 %v1317_v9  ;;  %v1320_v12 = vadd.f32 1.0, %v2701_v26  ;;  %v1095_v14 = vpop.f32.mrf.mxu0  ;;  %v1406_v50 = vpack.c.bf16 %v2699_v46, %v3496_v25  ;;  %v899_v25 = vadd.f32 %v3491_v17, %v3411_v59 }
 0x13b   :  { %v2705_v30 = vpop.eup %2704  ;;  %2728 = vpow2.f32 %v2364_v34  ;;  %v2365_v16 = vmul.f32 -1.442695, %v1198_v57  ;;  %v1203_v28 = vadd.f32 %v3434_v7, %v1164_v61  ;;  %v1162_v42 = vadd.f32 %v1095_v14, %v883_v6  ;;  %v2564_v6 = vpop.f32.mrf.mxu1 }
 0x13c   :  { %v3516_v38 = vpop.eup %2706  ;;  %2730 = vrcp.f32 %v1320_v12  ;;  %v1318_v8 = vadd.f32 1.0, %v2705_v30  ;;  %v2590_v10 = vpop.f32.mrf.mxu0  ;;  %v1405_v51 = vpack.c.bf16 %v2703_v47, %v2695_v54  ;;  %v910_v54 = vadd.f32 %v3501_v31, %v3413_v60 }
 0x13d   :  { %v2709_v18 = vpop.eup %2708  ;;  %2732 = vpow2.f32 %v2367_v36  ;;  %v2370_v21 = vmul.f32 -1.442695, %v1203_v28  ;;  %v1201_v24 = vadd.f32 %v3434_v7, %v1162_v42  ;;  %v1165_v4 = vadd.f32 %v2590_v10, %v894_v27 }
 0x13e   :  { %v2711_v19 = vpop.eup %2710  ;;  %2734 = vrcp.f32 %v1318_v8  ;;  %v1323_v45 = vadd.f32 1.0, %v2709_v18  ;;  %2615 = vmatprep.mubr.bf16.mxu1 %v1405_v51  ;;  %v1098_v41 = vpop.f32.mrf.mxu0  ;;  %v902_v26 = vadd.f32 %v3509_v35, %v3417_v62  ;;  %v923_v36 = vadd.f32 %v2563_v11, %v3419_v63 }
 0x13f   :  { %v2713_v53 = vpop.eup %2712  ;;  %2736 = vpow2.f32 %v2365_v16  ;;  %v2368_v39 = vmul.f32 -1.442695, %v1201_v24  ;;  %v1204_v3 = vadd.f32 %v3434_v7, %v1165_v4  ;;  %v1163_v43 = vadd.f32 %v1098_v41, %v886_v0  ;;  %2616 = vmatmul.mubr.bf16.vlgmr.msra.gmra.mxu1 %v1406_v50  ;;  %v917_v62 = vpop.f32.mrf.mxu1  ;;  %v3822_v4 = vld [vmem:[#allocation3_spill] sm:$0xff] }
 0x140   :  { %v2715_v15 = vpop.eup %2714  ;;  %2738 = vrcp.f32 %v1323_v45  ;;  %v1321_v32 = vadd.f32 1.0, %v2713_v53  ;;  %v2593_v48 = vpop.f32.mrf.mxu0  ;;  %v915_v50 = vadd.f32 %v914_v56, %v3423_v1  ;;  %v926_v0 = vadd.f32 %v2564_v6, %v3425_v2 }
 0x141   :  { %v2717_v40 = vpop.eup %2716  ;;  %2740 = vpow2.f32 %v2370_v21  ;;  %v2371_v37 = vmul.f32 -1.442695, %v1204_v3  ;;  %v1202_v20 = vadd.f32 %v3434_v7, %v1163_v43  ;;  %v1168_v44 = vadd.f32 %v2593_v48, %v907_v29 }
 0x142   :  { %v2719_v58 = vpop.eup %2718  ;;  %2742 = vrcp.f32 %v1321_v32  ;;  %v1324_v33 = vadd.f32 1.0, %v2717_v40  ;;  %v1111_v52 = vpop.f32.mrf.mxu0  ;;  %v1408_v13 = vpack.c.bf16 %v2715_v15, %v3516_v38 }
 0x143   :  { %v2721_v59 = vpop.eup %2720  ;;  %2744 = vpow2.f32 %v2368_v39  ;;  %v2369_v17 = vmul.f32 -1.442695, %v1202_v20  ;;  %v1207_v23 = vadd.f32 %v3434_v7, %v1168_v44  ;;  %v1166_v22 = vadd.f32 %v1111_v52, %v899_v25 }
 0x144   :  { %2746 = vrcp.f32 %v1324_v33  ;;  %v1322_v34 = vadd.f32 1.0, %v2721_v59  ;;  %v2594_v49 = vpop.f32.mrf.mxu0  ;;  %v1407_v55 = vpack.c.bf16 %v2719_v58, %v2711_v19  ;;  %v918_v19 = vadd.f32 %v917_v62, %v3822_v4 }
 0x145   :  { %v2723_v46 = vpop.eup %2722  ;;  %2748 = vpow2.f32 %v2371_v37  ;;  %v2374_v9 = vmul.f32 -1.442695, %v1207_v23  ;;  %v1205_v60 = vadd.f32 %v3434_v7, %v1166_v22  ;;  %v1169_v31 = vadd.f32 %v2594_v49, %v910_v54 }
 0x146   :  { %v2725_v5 = vpop.eup %2724  ;;  %2750 = vrcp.f32 %v1322_v34  ;;  %2619 = vmatprep.mubr.bf16.mxu1 %v1407_v55  ;;  %v1114_v57 = vpop.f32.mrf.mxu0 }
 0x147   :  { %v2727_v61 = vpop.eup %2726  ;;  %v1327_v47 = vadd.f32 1.0, %v2725_v5  ;;  %2752 = vpow2.f32 %v2369_v17  ;;  %v2372_v27 = vmul.f32 -1.442695, %v1205_v60  ;;  %v1208_v12 = vadd.f32 %v3434_v7, %v1169_v31  ;;  %2620 = vmatmul.mubr.bf16.gmra.mxu1 %v1408_v13 }
 0x148   :  { %v2729_v14 = vpop.eup %2728  ;;  %2754 = vpow2.f32 %v2374_v9  ;;  %v1167_v30 = vadd.f32 %v1114_v57, %v902_v26  ;;  %v2597_v16 = vpop.f32.mrf.mxu0 }
 0x149   :  { %v2731_v28 = vpop.eup %2730  ;;  %2756 = vrcp.f32 %v1327_v47  ;;  %v1325_v63 = vadd.f32 1.0, %v2729_v14  ;;  %v2375_v35 = vmul.f32 -1.442695, %v1208_v12  ;;  %v1172_v42 = vadd.f32 %v2597_v16, %v923_v36 }
 0x14a   :  { %v2733_v38 = vpop.eup %2732  ;;  %2758 = vpow2.f32 %v2372_v27  ;;  %v1206_v8 = vadd.f32 %v3434_v7, %v1167_v30  ;;  %v1127_v10 = vpop.f32.mrf.mxu0  ;;  %v1410_v51 = vpack.c.bf16 %v2731_v28, %v2723_v46 }
 0x14b   :  { %v2735_v18 = vpop.eup %2734  ;;  %2760 = vrcp.f32 %v1325_v63  ;;  %v1328_v1 = vadd.f32 1.0, %v2733_v38  ;;  %v1211_v11 = vadd.f32 %v3434_v7, %v1172_v42  ;;  %v1170_v21 = vadd.f32 %v1127_v10, %v915_v50 }
 0x14c   :  { %v2737_v24 = vpop.eup %2736  ;;  %2762 = vpow2.f32 %v2375_v35  ;;  %v2373_v29 = vmul.f32 -1.442695, %v1206_v8  ;;  %v2598_v45 = vpop.f32.mrf.mxu0  ;;  %v1409_v41 = vpack.c.bf16 %v2735_v18, %v2727_v61 }
 0x14d   :  { %v2739_v53 = vpop.eup %2738  ;;  %2764 = vrcp.f32 %v1328_v1  ;;  %v1326_v2 = vadd.f32 1.0, %v2737_v24  ;;  %v2378_v39 = vmul.f32 -1.442695, %v1211_v11  ;;  %v1209_v3 = vadd.f32 %v3434_v7, %v1170_v21 }
 0x14e   :  { %v2741_v43 = vpop.eup %2740  ;;  %2766 = vpow2.f32 %v2373_v29  ;;  %v1173_v15 = vadd.f32 %v2598_v45, %v926_v0  ;;  %2623 = vmatprep.mubr.bf16.mxu1 %v1409_v41  ;;  %v1130_v25 = vpop.f32.mrf.mxu0 }
 0x14f   :  { %v2743_v32 = vpop.eup %2742  ;;  %2768 = vrcp.f32 %v1326_v2  ;;  %v1331_v48 = vadd.f32 1.0, %v2741_v43  ;;  %v2376_v40 = vmul.f32 -1.442695, %v1209_v3  ;;  %v1171_v56 = vadd.f32 %v1130_v25, %v918_v19  ;;  %2624 = vmatmul.mubr.bf16.gmra.mxu1 %v1410_v51  ;;  %v3547_v2 = vld [vmem:[%s3817_s8] ss:$0 sm:$0xff] }
 0x150   :  { %v2745_v37 = vpop.eup %2744  ;;  %2770 = vpow2.f32 %v2378_v39  ;;  %v1212_v20 = vadd.f32 %v3434_v7, %v1173_v15 }
 0x151   :  { %v2747_v44 = vpop.eup %2746  ;;  %2772 = vrcp.f32 %v1331_v48  ;;  %v1329_v58 = vadd.f32 1.0, %v2745_v37  ;;  %v1210_v54 = vadd.f32 %v3434_v7, %v1171_v56 }
 0x152   :  { %v2749_v33 = vpop.eup %2748  ;;  %2774 = vpow2.f32 %v2376_v40  ;;  %v2379_v52 = vmul.f32 -1.442695, %v1212_v20  ;;  %v1412_v13 = vpack.c.bf16 %v2747_v44, %v2739_v53 }
 0x153   :  { %v2751_v59 = vpop.eup %2750  ;;  %2776 = vrcp.f32 %v1329_v58  ;;  %v1332_v17 = vadd.f32 1.0, %v2749_v33  ;;  %v2377_v23 = vmul.f32 -1.442695, %v1210_v54 }
 0x154   :  { %v2753_v22 = vpop.eup %2752  ;;  %2778 = vpow2.f32 %v2379_v52  ;;  %v1411_v34 = vpack.c.bf16 %v2751_v59, %v2743_v32 }
 0x155   :  { %v2755_v49 = vpop.eup %2754  ;;  %2780 = vrcp.f32 %v1332_v17  ;;  %v1330_v55 = vadd.f32 1.0, %v2753_v22 }
 0x156   :  { %v2757_v46 = vpop.eup %2756  ;;  %2782 = vpow2.f32 %v2377_v23  ;;  %2627 = vmatprep.mubr.bf16.mxu1 %v1411_v34  ;;  %v1335_v7 = vadd.f32 1.0, %v2755_v49 }
 0x157   :  { %v2759_v6 = vpop.eup %2758  ;;  %2784 = vrcp.f32 %v1330_v55  ;;  %2628 = vmatmul.mubr.bf16.gmra.mxu1 %v1412_v13 }
 0x158   :  { %v2761_v9 = vpop.eup %2760  ;;  %v1333_v31 = vadd.f32 1.0, %v2759_v6  ;;  %2786 = vrcp.f32 %v1335_v7 }
 0x159   :  { %v2763_v60 = vpop.eup %2762 }
 0x15a   :  { %v2765_v5 = vpop.eup %2764  ;;  %v1336_v26 = vadd.f32 1.0, %v2763_v60 }
 0x15b   :  { %v2767_v36 = vpop.eup %2766  ;;  %v1414_v57 = vpack.c.bf16 %v2765_v5, %v2757_v46 }
 0x15c   :  { %v2769_v61 = vpop.eup %2768  ;;  %2788 = vrcp.f32 %v1336_v26  ;;  %v1334_v47 = vadd.f32 1.0, %v2767_v36 }
 0x15d   :  { %v2771_v27 = vpop.eup %2770  ;;  %2790 = vrcp.f32 %v1333_v31  ;;  %v1413_v12 = vpack.c.bf16 %v2769_v61, %v2761_v9 }
 0x15e   :  { %v2773_v14 = vpop.eup %2772  ;;  %2792 = vrcp.f32 %v1334_v47  ;;  %v1339_v30 = vadd.f32 1.0, %v2771_v27 }
 0x15f   :  { %v2775_v50 = vpop.eup %2774  ;;  %2631 = vmatprep.mubr.bf16.mxu1 %v1413_v12 }
 0x160   :  { %v2777_v16 = vpop.eup %2776  ;;  %2632 = vmatmul.mubr.bf16.gmra.mxu1 %v1414_v57  ;;  %v1337_v62 = vadd.f32 1.0, %v2775_v50  ;;  %2794 = vrcp.f32 %v1339_v30 }
 0x161   :  { %v2779_v28 = vpop.eup %2778 }
 0x162   :  { %v2781_v63 = vpop.eup %2780  ;;  %v1340_v35 = vadd.f32 1.0, %v2779_v28 }
 0x163   :  { %v2783_v42 = vpop.eup %2782  ;;  %v1416_v38 = vpack.c.bf16 %v2781_v63, %v2773_v14 }
 0x164   :  { %v2785_v0 = vpop.eup %2784  ;;  %2796 = vrcp.f32 %v1340_v35  ;;  %v1338_v8 = vadd.f32 1.0, %v2783_v42 }
 0x165   :  { %2798 = vrcp.f32 %v1337_v62  ;;  %v1415_v10 = vpack.c.bf16 %v2785_v0, %v2777_v16  ;;  %v2787_v51 = vpop.eup %2786 }
 0x166   :  { %2800 = vrcp.f32 %v1338_v8 }
 0x167   :  { %2635 = vmatprep.mubr.bf16.mxu1 %v1415_v10 }
 0x168   :  { %2636 = vmatmul.mubr.bf16.gmra.mxu1 %v1416_v38 }
 0x169   :  { %v2789_v18 = vpop.eup %2788 }
 0x16a   :  { %v2791_v1 = vpop.eup %2790  ;;  %v1418_v11 = vpack.c.bf16 %v2789_v18, %v2787_v51 }
 0x16b   :  { %v2793_v21 = vpop.eup %2792 }
 0x16c   :  { %v1417_v24 = vpack.c.bf16 %v2793_v21, %v2791_v1 }
 0x16d   :  { %v2795_v4 = vpop.eup %2794 }
 0x16e   :  { %2639 = vmatprep.mubr.bf16.mxu1 %v1417_v24 }
 0x170   :  { %2640 = vmatmul.mubr.bf16.gmra.mxu1 %v1418_v11 }
 0x171   :  { %v2797_v19 = vpop.eup %2796 }
 0x172   :  { %v2799_v29 = vpop.eup %2798  ;;  %v1420_v45 = vpack.c.bf16 %v2797_v19, %v2795_v4 }
 0x173   :  { %v2801_v41 = vpop.eup %2800 }
 0x174   :  { %v1419_v53 = vpack.c.bf16 %v2801_v41, %v2799_v29 }
 0x176   :  { %2643 = vmatprep.mubr.bf16.mxu1 %v1419_v53  ;;  %v3568_v53 = vld [vmem:[%s3818_s9] ss:$0 sm:$0xff] }
 0x178   :  { %2644 = vmatmul.mubr.bf16.gmra.mxu1 %v1420_v45 }
 0x1ff   :  { %v2617_v39 = vpop.f32.mrf.mxu1 }
 0x200   :  { %v1535_v3 = vadd.f32 %v2617_v39, %v3547_v2 }
 0x201   :  { %v1526_v43 = vpop.f32.mrf.mxu1 }
 0x202   :  { %v2391_v15 = vmul.f32 -1.442695, %v1535_v3  ;;  %v1527_v25 = vadd.f32 %v3547_v2, %v1526_v43 }
 0x203   :  { %v2618_v32 = vpop.f32.mrf.mxu1 }
 0x204   :  { %2802 = vpow2.f32 %v2391_v15  ;;  %v2389_v48 = vmul.f32 -1.442695, %v1527_v25  ;;  %v1538_v40 = vadd.f32 %v2618_v32, %v3547_v2 }
 0x205   :  { %v1529_v56 = vpop.f32.mrf.mxu1 }
 0x206   :  { %2804 = vpow2.f32 %v2389_v48  ;;  %v2392_v37 = vmul.f32 -1.442695, %v1538_v40  ;;  %v1530_v20 = vadd.f32 %v3547_v2, %v1529_v56 }
 0x207   :  { %v2621_v44 = vpop.f32.mrf.mxu1 }
 0x208   :  { %2806 = vpow2.f32 %v2392_v37  ;;  %v2390_v58 = vmul.f32 -1.442695, %v1530_v20  ;;  %v1551_v54 = vadd.f32 %v2621_v44, %v3547_v2 }
 0x209   :  { %v1542_v33 = vpop.f32.mrf.mxu1 }
 0x20a   :  { %2808 = vpow2.f32 %v2390_v58  ;;  %v2395_v52 = vmul.f32 -1.442695, %v1551_v54  ;;  %v1543_v13 = vadd.f32 %v3547_v2, %v1542_v33 }
 0x20b   :  { %v2622_v59 = vpop.f32.mrf.mxu1 }
 0x20c   :  { %2810 = vpow2.f32 %v2395_v52  ;;  %v2393_v17 = vmul.f32 -1.442695, %v1543_v13  ;;  %v1554_v23 = vadd.f32 %v2622_v59, %v3547_v2 }
 0x20d   :  { %v1545_v22 = vpop.f32.mrf.mxu1 }
 0x20e   :  { %2812 = vpow2.f32 %v2393_v17  ;;  %v2396_v34 = vmul.f32 -1.442695, %v1554_v23  ;;  %v1546_v49 = vadd.f32 %v3547_v2, %v1545_v22 }
 0x20f   :  { %v2625_v55 = vpop.f32.mrf.mxu1 }
 0x210   :  { %2814 = vpow2.f32 %v2396_v34  ;;  %v2394_v46 = vmul.f32 -1.442695, %v1546_v49  ;;  %v1567_v6 = vadd.f32 %v2625_v55, %v3547_v2 }
 0x211   :  { %v2803_v7 = vpop.eup %2802  ;;  %v1558_v9 = vpop.f32.mrf.mxu1 }
 0x212   :  { %v1751_v60 = vadd.f32 1.0, %v2803_v7  ;;  %2816 = vpow2.f32 %v2394_v46  ;;  %v2399_v31 = vmul.f32 -1.442695, %v1567_v6  ;;  %v1559_v5 = vadd.f32 %v3547_v2, %v1558_v9 }
 0x213   :  { %v2805_v26 = vpop.eup %2804  ;;  %v2626_v36 = vpop.f32.mrf.mxu1 }
 0x214   :  { %2818 = vrcp.f32 %v1751_v60  ;;  %v1749_v57 = vadd.f32 1.0, %v2805_v26  ;;  %v2397_v61 = vmul.f32 -1.442695, %v1559_v5  ;;  %v1570_v47 = vadd.f32 %v2626_v36, %v3547_v2 }
 0x215   :  { %v2807_v27 = vpop.eup %2806  ;;  %2820 = vpow2.f32 %v2399_v31  ;;  %v1561_v12 = vpop.f32.mrf.mxu1 }
 0x216   :  { %2822 = vrcp.f32 %v1749_v57  ;;  %v1752_v14 = vadd.f32 1.0, %v2807_v27  ;;  %v2400_v50 = vmul.f32 -1.442695, %v1570_v47  ;;  %v1562_v30 = vadd.f32 %v3547_v2, %v1561_v12 }
 0x217   :  { %v2809_v16 = vpop.eup %2808  ;;  %2824 = vpow2.f32 %v2397_v61  ;;  %v2629_v28 = vpop.f32.mrf.mxu1 }
 0x218   :  { %2826 = vrcp.f32 %v1752_v14  ;;  %v1750_v62 = vadd.f32 1.0, %v2809_v16  ;;  %v2398_v63 = vmul.f32 -1.442695, %v1562_v30  ;;  %v1583_v35 = vadd.f32 %v2629_v28, %v3547_v2 }
 0x219   :  { %v2811_v42 = vpop.eup %2810  ;;  %2828 = vpow2.f32 %v2400_v50  ;;  %v1574_v38 = vpop.f32.mrf.mxu1 }
 0x21a   :  { %2830 = vrcp.f32 %v1750_v62  ;;  %v1755_v0 = vadd.f32 1.0, %v2811_v42  ;;  %v2403_v8 = vmul.f32 -1.442695, %v1583_v35  ;;  %v1575_v10 = vadd.f32 %v3547_v2, %v1574_v38 }
 0x21b   :  { %v2813_v51 = vpop.eup %2812  ;;  %2832 = vpow2.f32 %v2398_v63  ;;  %v2630_v18 = vpop.f32.mrf.mxu1 }
 0x21c   :  { %2834 = vrcp.f32 %v1755_v0  ;;  %v1753_v1 = vadd.f32 1.0, %v2813_v51  ;;  %v2401_v11 = vmul.f32 -1.442695, %v1575_v10  ;;  %v1586_v21 = vadd.f32 %v2630_v18, %v3547_v2 }
 0x21d   :  { %v2815_v24 = vpop.eup %2814  ;;  %2836 = vpow2.f32 %v2403_v8  ;;  %v1577_v4 = vpop.f32.mrf.mxu1 }
 0x21e   :  { %2838 = vrcp.f32 %v1753_v1  ;;  %v1756_v19 = vadd.f32 1.0, %v2815_v24  ;;  %v2404_v29 = vmul.f32 -1.442695, %v1586_v21  ;;  %v1578_v45 = vadd.f32 %v3547_v2, %v1577_v4 }
 0x21f   :  { %v2817_v41 = vpop.eup %2816  ;;  %2840 = vpow2.f32 %v2401_v11 }
 0x220   :  { %2842 = vrcp.f32 %v1756_v19  ;;  %v1754_v39 = vadd.f32 1.0, %v2817_v41  ;;  %v2402_v3 = vmul.f32 -1.442695, %v1578_v45  ;;  %v2633_v43 = vpop.f32.mrf.mxu1 }
 0x221   :  { %v2819_v15 = vpop.eup %2818  ;;  %2844 = vpow2.f32 %v2404_v29  ;;  %v1599_v25 = vadd.f32 %v2633_v43, %v3547_v2 }
 0x222   :  { %v2821_v32 = vpop.eup %2820  ;;  %2846 = vrcp.f32 %v1754_v39  ;;  %v1590_v48 = vpop.f32.mrf.mxu1  ;;  %v1854_v40 = vmul.f32 %v2819_v15, %v3568_v53 }
 0x223   :  { %v2823_v56 = vpop.eup %2822  ;;  %v1759_v37 = vadd.f32 1.0, %v2821_v32  ;;  %2848 = vpow2.f32 %v2402_v3  ;;  %v2407_v20 = vmul.f32 -1.442695, %v1599_v25  ;;  %v1591_v44 = vadd.f32 %v3547_v2, %v1590_v48 }
 0x224   :  { %v2825_v58 = vpop.eup %2824  ;;  %v2634_v54 = vpop.f32.mrf.mxu1  ;;  %1888 = vadd.xlane.f32.xlu1 %v1854_v40  ;;  %v1852_v33 = vmul.f32 %v2823_v56, %v3568_v53 }
 0x225   :  { %v2827_v52 = vpop.eup %2826  ;;  %2850 = vrcp.f32 %v1759_v37  ;;  %v1757_v13 = vadd.f32 1.0, %v2825_v58  ;;  %v2405_v59 = vmul.f32 -1.442695, %v1591_v44  ;;  %v1602_v17 = vadd.f32 %v2634_v54, %v3547_v2 }
 0x226   :  { %v2829_v23 = vpop.eup %2828  ;;  %2852 = vpow2.f32 %v2407_v20  ;;  %v1593_v22 = vpop.f32.mrf.mxu1  ;;  %1884 = vadd.xlane.f32.xlu0 %v1852_v33  ;;  %v1855_v34 = vmul.f32 %v2827_v52, %v3568_v53 }
 0x227   :  { %v2831_v49 = vpop.eup %2830  ;;  %2854 = vrcp.f32 %v1757_v13  ;;  %v1760_v55 = vadd.f32 1.0, %v2829_v23  ;;  %v2408_v46 = vmul.f32 -1.442695, %v1602_v17  ;;  %v1594_v6 = vadd.f32 %v3547_v2, %v1593_v22 }
 0x228   :  { %v2833_v7 = vpop.eup %2832  ;;  %2856 = vpow2.f32 %v2405_v59  ;;  %v2637_v9 = vpop.f32.mrf.mxu1  ;;  %1890 = vadd.xlane.f32.xlu1 %v1855_v34  ;;  %v1853_v60 = vmul.f32 %v2831_v49, %v3568_v53 }
 0x229   :  { %v2835_v31 = vpop.eup %2834  ;;  %2858 = vrcp.f32 %v1760_v55  ;;  %v1758_v5 = vadd.f32 1.0, %v2833_v7  ;;  %v2406_v26 = vmul.f32 -1.442695, %v1594_v6  ;;  %v1615_v36 = vadd.f32 %v2637_v9, %v3547_v2 }
 0x22a   :  { %v2837_v57 = vpop.eup %2836  ;;  %2860 = vpow2.f32 %v2408_v46  ;;  %v1606_v61 = vpop.f32.mrf.mxu1  ;;  %1886 = vadd.xlane.f32.xlu0 %v1853_v60  ;;  %v1858_v16 = vmul.f32 %v2835_v31, %v3568_v53 }
 0x22b   :  { %v2839_v47 = vpop.eup %2838  ;;  %2862 = vrcp.f32 %v1758_v5  ;;  %v1763_v27 = vadd.f32 1.0, %v2837_v57  ;;  %v2411_v12 = vmul.f32 -1.442695, %v1615_v36  ;;  %v1607_v14 = vadd.f32 %v3547_v2, %v1606_v61 }
 0x22c   :  { %v2841_v50 = vpop.eup %2840  ;;  %2864 = vpow2.f32 %v2406_v26  ;;  %v2638_v30 = vpop.f32.mrf.mxu1  ;;  %v1856_v21 = vmul.f32 %v2839_v47, %v3568_v53 }
 0x22d   :  { %v2843_v28 = vpop.eup %2842  ;;  %2866 = vrcp.f32 %v1763_v27  ;;  %v1761_v62 = vadd.f32 1.0, %v2841_v50  ;;  %v2409_v63 = vmul.f32 -1.442695, %v1607_v14  ;;  %v1618_v35 = vadd.f32 %v2638_v30, %v3547_v2 }
 0x22e   :  { %v2845_v42 = vpop.eup %2844  ;;  %2868 = vpow2.f32 %v2411_v12  ;;  %v1609_v38 = vpop.f32.mrf.mxu1  ;;  %1896 = vadd.xlane.f32.xlu0 %v1858_v16  ;;  %v1859_v0 = vmul.f32 %v2843_v28, %v3568_v53 }
 0x22f   :  { %v2847_v8 = vpop.eup %2846  ;;  %2870 = vrcp.f32 %v1761_v62  ;;  %v1764_v10 = vadd.f32 1.0, %v2845_v42  ;;  %v2412_v51 = vmul.f32 -1.442695, %v1618_v35  ;;  %v1610_v18 = vadd.f32 %v3547_v2, %v1609_v38 }
 0x230   :  { %v2849_v1 = vpop.eup %2848  ;;  %2872 = vpow2.f32 %v2409_v63  ;;  %v2641_v11 = vpop.f32.mrf.mxu1  ;;  %1898 = vadd.xlane.f32.xlu1 %v1859_v0  ;;  %v1857_v41 = vmul.f32 %v2847_v8, %v3568_v53 }
 0x231   :  { %2874 = vrcp.f32 %v1764_v10  ;;  %v1762_v24 = vadd.f32 1.0, %v2849_v1  ;;  %v2410_v4 = vmul.f32 -1.442695, %v1610_v18  ;;  %v1631_v19 = vadd.f32 %v2641_v11, %v3547_v2 }
 0x232   :  { %v2851_v29 = vpop.eup %2850  ;;  %2876 = vpow2.f32 %v2412_v51  ;;  %v1622_v45 = vpop.f32.mrf.mxu1  ;;  %1892 = vadd.xlane.f32.xlu0 %v1856_v21 }
 0x233   :  { %v2853_v39 = vpop.eup %2852  ;;  %2878 = vrcp.f32 %v1762_v24  ;;  %v2415_v3 = vmul.f32 -1.442695, %v1631_v19  ;;  %v1623_v43 = vadd.f32 %v3547_v2, %v1622_v45  ;;  %v1862_v48 = vmul.f32 %v2851_v29, %v3568_v53 }
 0x234   :  { %v2855_v15 = vpop.eup %2854  ;;  %v1767_v25 = vadd.f32 1.0, %v2853_v39  ;;  %2880 = vpow2.f32 %v2410_v4  ;;  %v2642_v32 = vpop.f32.mrf.mxu1  ;;  %1894 = vadd.xlane.f32.xlu1 %v1857_v41 }
 0x235   :  { %v2857_v40 = vpop.eup %2856  ;;  %2882 = vpow2.f32 %v2415_v3  ;;  %v2413_v56 = vmul.f32 -1.442695, %v1623_v43  ;;  %v1634_v37 = vadd.f32 %v2642_v32, %v3547_v2  ;;  %v1860_v22 = vmul.f32 %v2855_v15, %v3568_v53 }
 0x236   :  { %v2859_v20 = vpop.eup %2858  ;;  %2884 = vrcp.f32 %v1767_v25  ;;  %v1765_v44 = vadd.f32 1.0, %v2857_v40  ;;  %v1625_v58 = vpop.f32.mrf.mxu1  ;;  %1904 = vadd.xlane.f32.xlu0 %v1862_v48 }
 0x237   :  { %v2861_v54 = vpop.eup %2860  ;;  %2886 = vpow2.f32 %v2413_v56  ;;  %v2416_v33 = vmul.f32 -1.442695, %v1634_v37  ;;  %v1626_v52 = vadd.f32 %v3547_v2, %v1625_v58  ;;  %v1863_v13 = vmul.f32 %v2859_v20, %v3568_v53 }
 0x238   :  { %v2863_v59 = vpop.eup %2862  ;;  %2888 = vrcp.f32 %v1765_v44  ;;  %v1768_v17 = vadd.f32 1.0, %v2861_v54  ;;  %v2645_v23 = vpop.f32.mrf.mxu1 }
 0x239   :  { %v2865_v34 = vpop.eup %2864  ;;  %2890 = vpow2.f32 %v2416_v33  ;;  %v2414_v49 = vmul.f32 -1.442695, %v1626_v52  ;;  %v1647_v55 = vadd.f32 %v2645_v23, %v3547_v2  ;;  %1906 = vadd.xlane.f32.xlu1 %v1863_v13  ;;  %v1861_v5 = vmul.f32 %v2863_v59, %v3568_v53 }
 0x23a   :  { %v2867_v46 = vpop.eup %2866  ;;  %2892 = vrcp.f32 %v1768_v17  ;;  %v1766_v6 = vadd.f32 1.0, %v2865_v34  ;;  %v1638_v7 = vpop.f32.mrf.mxu1  ;;  %1900 = vadd.xlane.f32.xlu0 %v1860_v22 }
 0x23b   :  { %v2869_v9 = vpop.eup %2868  ;;  %2894 = vpow2.f32 %v2414_v49  ;;  %v2419_v60 = vmul.f32 -1.442695, %v1647_v55  ;;  %v1639_v31 = vadd.f32 %v3547_v2, %v1638_v7  ;;  %v1866_v61 = vmul.f32 %v2867_v46, %v3568_v53 }
 0x23c   :  { %v2871_v26 = vpop.eup %2870  ;;  %2896 = vrcp.f32 %v1766_v6  ;;  %v1771_v36 = vadd.f32 1.0, %v2869_v9  ;;  %v2646_v57 = vpop.f32.mrf.mxu1 }
 0x23d   :  { %v2873_v47 = vpop.eup %2872  ;;  %2898 = vpow2.f32 %v2419_v60  ;;  %v2417_v27 = vmul.f32 -1.442695, %v1639_v31  ;;  %v1650_v12 = vadd.f32 %v2646_v57, %v3547_v2  ;;  %1902 = vadd.xlane.f32.xlu1 %v1861_v5  ;;  %v1864_v38 = vmul.f32 %v2871_v26, %v3568_v53 }
 0x23e   :  { %v2875_v14 = vpop.eup %2874  ;;  %2900 = vrcp.f32 %v1771_v36  ;;  %v1769_v50 = vadd.f32 1.0, %v2873_v47  ;;  %v1641_v30 = vpop.f32.mrf.mxu1  ;;  %1912 = vadd.xlane.f32.xlu0 %v1866_v61 }
 0x23f   :  { %v2877_v16 = vpop.eup %2876  ;;  %2902 = vpow2.f32 %v2417_v27  ;;  %v2420_v28 = vmul.f32 -1.442695, %v1650_v12  ;;  %v1642_v62 = vadd.f32 %v3547_v2, %v1641_v30  ;;  %v1867_v63 = vmul.f32 %v2875_v14, %v3568_v53  ;;  %v2930_v30 = vld [vmem:[%s3813_s2] sm:$0xf] }
 0x240   :  { %v2879_v35 = vpop.eup %2878  ;;  %2904 = vrcp.f32 %v1769_v50  ;;  %v1772_v42 = vadd.f32 1.0, %v2877_v16  ;;  %v3621_v50 = vstv %s3819_s0  ;;  %v1982_v16 = vunpack.c.l.bf16 %v2930_v30 }
 0x241   :  { %v2881_v0 = vpop.eup %2880  ;;  %2906 = vpow2.f32 %v2420_v28  ;;  %v2418_v8 = vmul.f32 -1.442695, %v1642_v62  ;;  %1914 = vadd.xlane.f32.xlu1 %v1867_v63  ;;  %v1865_v2 = vmul.f32 %v2879_v35, %v3568_v53 }
 0x242   :  { %v2883_v10 = vpop.eup %2882  ;;  %2908 = vrcp.f32 %v1772_v42  ;;  %v1770_v51 = vadd.f32 1.0, %v2881_v0  ;;  %1908 = vadd.xlane.f32.xlu0 %v1864_v38  ;;  %v2932_v42 = vld [vmem:[%s3813_s2 + $0x4] sm:$0xf] }
 0x243   :  { %v2885_v18 = vpop.eup %2884  ;;  %v1775_v1 = vadd.f32 1.0, %v2883_v10  ;;  %2910 = vpow2.f32 %v2418_v8  ;;  %v1983_v38 = vunpack.c.l.bf16 %v2932_v42  ;;  %v2933_v8 = vld [vmem:[%s3813_s2 + $0x8] sm:$0xf] }
 0x244   :  { %v2887_v11 = vpop.eup %2886  ;;  %2912 = vrcp.f32 %v1770_v51  ;;  %v1870_v21 = vmul.f32 %v2885_v18, %v3568_v53  ;;  %v1984_v10 = vunpack.c.l.bf16 %v2933_v8 }
 0x245   :  { %v2889_v24 = vpop.eup %2888  ;;  %2914 = vrcp.f32 %v1775_v1  ;;  %v1773_v4 = vadd.f32 1.0, %v2887_v11  ;;  %1910 = vadd.xlane.f32.xlu1 %v1865_v2 }
 0x246   :  { %v2891_v19 = vpop.eup %2890  ;;  %1920 = vadd.xlane.f32.xlu0 %v1870_v21  ;;  %v1868_v3 = vmul.f32 %v2889_v24, %v3568_v53 }
 0x247   :  { %v2893_v29 = vpop.eup %2892  ;;  %v1776_v45 = vadd.f32 1.0, %v2891_v19  ;;  %2916 = vrcp.f32 %v1773_v4  ;;  %v2934_v19 = vld [vmem:[%s3813_s2 + $0x1c] sm:$0xf] }
 0x248   :  { %v2895_v41 = vpop.eup %2894  ;;  %v1871_v39 = vmul.f32 %v2893_v29, %v3568_v53  ;;  %v1989_v29 = vunpack.c.l.bf16 %v2934_v19 }
 0x249   :  { %v2897_v43 = vpop.eup %2896  ;;  %2918 = vrcp.f32 %v1776_v45  ;;  %v1774_v15 = vadd.f32 1.0, %v2895_v41  ;;  %v2935_v45 = vld [vmem:[%s3813_s2 + $0x18] sm:$0xf] }
 0x24a   :  { %v2899_v25 = vpop.eup %2898  ;;  %1922 = vadd.xlane.f32.xlu1 %v1871_v39  ;;  %1916 = vadd.xlane.f32.xlu0 %v1868_v3  ;;  %v1869_v56 = vmul.f32 %v2897_v43, %v3568_v53  ;;  %v1988_v41 = vunpack.c.l.bf16 %v2935_v45 }
 0x24b   :  { %v2901_v32 = vpop.eup %2900  ;;  %2920 = vrcp.f32 %v1774_v15  ;;  %v1779_v40 = vadd.f32 1.0, %v2899_v25 }
 0x24c   :  { %v2903_v48 = vpop.eup %2902  ;;  %v1874_v37 = vmul.f32 %v2901_v32, %v3568_v53  ;;  %v2936_v32 = vld [vmem:[%s3813_s2 + $0x10] sm:$0xf] }
 0x24d   :  { %v2905_v20 = vpop.eup %2904  ;;  %v1777_v44 = vadd.f32 1.0, %v2903_v48  ;;  %v1986_v48 = vunpack.c.l.bf16 %v2936_v32 }
 0x24e   :  { %v2907_v58 = vpop.eup %2906  ;;  %1918 = vadd.xlane.f32.xlu1 %v1869_v56  ;;  %1928 = vadd.xlane.f32.xlu0 %v1874_v37  ;;  %v1872_v59 = vmul.f32 %v2905_v20, %v3568_v53 }
 0x24f   :  { %v2909_v54 = vpop.eup %2908  ;;  %2922 = vrcp.f32 %v1777_v44  ;;  %v1780_v33 = vadd.f32 1.0, %v2907_v58  ;;  %v2937_v58 = vld [vmem:[%s3813_s2 + $0x14] sm:$0xf] }
 0x250   :  { %v2911_v52 = vpop.eup %2910  ;;  %2924 = vrcp.f32 %v1779_v40  ;;  %v1875_v13 = vmul.f32 %v2909_v54, %v3568_v53  ;;  %v1987_v54 = vunpack.c.l.bf16 %v2937_v58 }
 0x251   :  { %v2913_v17 = vpop.eup %2912  ;;  %2926 = vrcp.f32 %v1780_v33  ;;  %v1778_v23 = vadd.f32 1.0, %v2911_v52 }
 0x252   :  { %v2915_v22 = vpop.eup %2914  ;;  %1930 = vadd.xlane.f32.xlu1 %v1875_v13  ;;  %1924 = vadd.xlane.f32.xlu0 %v1872_v59  ;;  %v1873_v34 = vmul.f32 %v2913_v17, %v3568_v53 }
 0x253   :  { %2928 = vrcp.f32 %v1778_v23  ;;  %v1878_v49 = vmul.f32 %v2915_v22, %v3568_v53 }
 0x254   :  { %v2917_v55 = vpop.eup %2916 }
 0x255   :  { %v1876_v7 = vmul.f32 %v2917_v55, %v3568_v53  ;;  %v2938_v55 = vld [vmem:[%s3813_s2 + $0x28] sm:$0xf] }
 0x256   :  { %v2919_v46 = vpop.eup %2918  ;;  %1926 = vadd.xlane.f32.xlu1 %v1873_v34  ;;  %1936 = vadd.xlane.f32.xlu0 %v1878_v49 }
 0x257   :  { %v1879_v6 = vmul.f32 %v2919_v46, %v3568_v53  ;;  %v1992_v46 = vunpack.c.l.bf16 %v2938_v55 }
 0x258   :  { %v2921_v9 = vpop.eup %2920 }
 0x259   :  { %v1877_v31 = vmul.f32 %v2921_v9, %v3568_v53 }
 0x25a   :  { %1938 = vadd.xlane.f32.xlu1 %v1879_v6  ;;  %1932 = vadd.xlane.f32.xlu0 %v1876_v7 }
 0x25c   :  { %v2923_v60 = vpop.eup %2922 }
 0x25d   :  { %v2925_v5 = vpop.eup %2924  ;;  %v1880_v26 = vmul.f32 %v2923_v60, %v3568_v53 }
 0x25e   :  { %v2927_v36 = vpop.eup %2926  ;;  %1934 = vadd.xlane.f32.xlu1 %v1877_v31  ;;  %v1882_v27 = vmul.f32 %v2925_v5, %v3568_v53 }
 0x25f   :  { %1940 = vadd.xlane.f32.xlu0 %v1880_v26  ;;  %v1883_v57 = vmul.f32 %v2927_v36, %v3568_v53  ;;  %v2939_v26 = vld [vmem:[%s3813_s2 + $0x2c] sm:$0xf] }
 0x260   :  { %v2929_v61 = vpop.eup %2928  ;;  %v1993_v36 = vunpack.c.l.bf16 %v2939_v26  ;;  %v2948_v26 = vld [vmem:[%s3813_s2 + $0x40] sm:$0xf] }
 0x261   :  { %v1881_v47 = vmul.f32 %v2929_v61, %v3568_v53  ;;  %v2931_v53 = vld [vmem:[%s3813_s2 + $0xc] sm:$0xf] }
 0x262   :  { %v1985_v63 = vunpack.c.l.bf16 %v2931_v53 }
 0x263   :  { %1942 = vadd.xlane.f32.xlu1 %v1881_v47  ;;  %1944 = vadd.xlane.f32.xlu0 %v1882_v27  ;;  %v2940_v27 = vld [vmem:[%s3813_s2 + $0x20] sm:$0xf] }
 0x267   :  { %1946 = vadd.xlane.f32.xlu1 %v1883_v57 }
 0x2ad   :  { %v1889_v12 = vpop.xlane.xlu1 %1888 }
 0x2ae   :  { %v1952_v51 = vadd.f32 %v3621_v50, %v1889_v12  ;;  %v1990_v12 = vunpack.c.l.bf16 %v2940_v27 }
 0x2af   :  { %v1885_v14 = vpop.xlane.xlu0 %1884 }
 0x2b0   :  { %v1950_v62 = vadd.f32 %v3621_v50, %v1885_v14  ;;  %v2016_v24 = vmul.f32 %v1984_v10, %v1952_v51 }
 0x2b1   :  { %v1891_v28 = vpop.xlane.xlu1 %1890 }
 0x2b2   :  { %v1953_v35 = vadd.f32 %v3621_v50, %v1891_v28  ;;  %v2014_v1 = vmul.f32 %v1982_v16, %v1950_v62  ;;  %v2055_v37 = vsel %vm423_vm1, %v2016_v24, 0.0 }
 0x2b3   :  { %v1887_v0 = vpop.xlane.xlu0 %1886 }
 0x2b4   :  { %v1951_v18 = vadd.f32 %v3621_v50, %v1887_v0  ;;  %v2017_v2 = vmul.f32 %v1985_v63, %v1953_v35  ;;  %v2046_v43 = vsel %vm423_vm1, %v2014_v1, 0.0  ;;  %v2941_v63 = vld [vmem:[%s3813_s2 + $0x24] sm:$0xf] }
 0x2b5   :  { %v1991_v35 = vunpack.c.l.bf16 %v2941_v63 }
 0x2b6   :  { %v2015_v11 = vmul.f32 %v1983_v38, %v1951_v18  ;;  %v2056_v15 = vsel %vm423_vm1, %v2017_v2, 0.0 }
 0x2b7   :  { %v1897_v21 = vpop.xlane.xlu0 %1896  ;;  %v2057_v33 = vadd.f32 %v2056_v15, %v2055_v37 }
 0x2b8   :  { %v2047_v4 = vsel %vm423_vm1, %v2015_v11, 0.0  ;;  %v1956_v39 = vadd.f32 %v3621_v50, %v1897_v21  ;;  %v2942_v21 = vld [vmem:[%s3813_s2 + $0x38] sm:$0xf] }
 0x2b9   :  { %v1899_v3 = vpop.xlane.xlu1 %1898  ;;  %v2048_v40 = vadd.f32 %v2047_v4, %v2046_v43  ;;  %v2058_v7 = vrot.slane %v2057_v33, 4  ;;  %v1996_v24 = vunpack.c.l.bf16 %v2942_v21 }
 0x2ba   :  { %v1957_v25 = vadd.f32 %v3621_v50, %v1899_v3  ;;  %v2020_v52 = vmul.f32 %v1988_v41, %v1956_v39  ;;  %v2943_v3 = vld [vmem:[%s3813_s2 + $0x3c] sm:$0xf] }
 0x2bb   :  { %v1893_v56 = vpop.xlane.xlu0 %1892  ;;  %v2049_v23 = vrot.slane %v2048_v40, 4  ;;  %v2059_v62 = vadd.f32 %v2058_v7, %v2057_v33  ;;  %v1997_v43 = vunpack.c.l.bf16 %v2943_v3 }
 0x2bc   :  { %v2021_v20 = vmul.f32 %v1989_v29, %v1957_v25  ;;  %v1954_v44 = vadd.f32 %v3621_v50, %v1893_v56  ;;  %v2073_v9 = vsel %vm423_vm1, %v2020_v52, 0.0  ;;  %v2944_v25 = vld [vmem:[%s3813_s2 + $0x30] sm:$0xf] }
 0x2bd   :  { %v1895_v13 = vpop.xlane.xlu1 %1894  ;;  %v2050_v61 = vadd.f32 %v2049_v23, %v2048_v40  ;;  %v2060_v19 = vrot.slane %v2059_v62, 2  ;;  %v1994_v32 = vunpack.c.l.bf16 %v2944_v25  ;;  %v2946_v23 = vld [vmem:[%s3813_s2 + $0x48] sm:$0xf] }
 0x2be   :  { %v2018_v59 = vmul.f32 %v1986_v48, %v1954_v44  ;;  %v1955_v17 = vadd.f32 %v3621_v50, %v1895_v13  ;;  %v2074_v22 = vsel %vm423_vm1, %v2021_v20, 0.0  ;;  %v2945_v48 = vld [vmem:[%s3813_s2 + $0x34] sm:$0xf] }
 0x2bf   :  { %v1905_v34 = vpop.xlane.xlu0 %1904  ;;  %v2075_v60 = vadd.f32 %v2074_v22, %v2073_v9  ;;  %v2051_v8 = vrot.slane %v2050_v61, 2  ;;  %v1995_v40 = vunpack.c.l.bf16 %v2945_v48  ;;  %v2000_v22 = vunpack.c.l.bf16 %v2946_v23 }
 0x2c0   :  { %v2019_v49 = vmul.f32 %v1987_v54, %v1955_v17  ;;  %v1960_v6 = vadd.f32 %v3621_v50, %v1905_v34  ;;  %v2064_v31 = vsel %vm423_vm1, %v2018_v59, 0.0  ;;  %v2061_v59 = vadd.f32 %v2060_v19, %v2059_v62  ;;  %v2947_v34 = vld [vmem:[%s3813_s2 + $0x4c] sm:$0xf]  ;;  %v3716_v62 = vld [vmem:[%s3813_s2 + $0x58] sm:$0xf] }
 0x2c1   :  { %v2076_v42 = vrot.slane %v2075_v60, 4  ;;  %v2052_v56 = vadd.f32 %v2051_v8, %v2050_v61 }
 0x2c2   :  { %v2065_v5 = vsel %vm423_vm1, %v2019_v49, 0.0  ;;  %v1907_v57 = vpop.xlane.xlu1 %1906  ;;  %v2024_v30 = vmul.f32 %v1992_v46, %v1960_v6  ;;  %v2001_v49 = vunpack.c.l.bf16 %v2947_v34  ;;  %v2062_v63 = vrot.slane %v2061_v59, 1 }
 0x2c3   :  { %v2066_v47 = vadd.f32 %v2065_v5, %v2064_v31  ;;  %v1901_v14 = vpop.xlane.xlu0 %1900  ;;  %v1961_v16 = vadd.f32 %v3621_v50, %v1907_v57  ;;  %v2077_v39 = vadd.f32 %v2076_v42, %v2075_v60  ;;  %v2949_v57 = vld [vmem:[%s3813_s2 + $0x44] sm:$0xf] }
 0x2c4   :  { %v1958_v28 = vadd.f32 %v3621_v50, %v1901_v14  ;;  %v2091_v2 = vsel %vm423_vm1, %v2024_v30, 0.0  ;;  %v1999_v61 = vunpack.c.l.bf16 %v2949_v57 }
 0x2c5   :  { %v2067_v53 = vrot.slane %v2066_v47, 4  ;;  %v2025_v38 = vmul.f32 %v1993_v36, %v1961_v16  ;;  %v2078_v55 = vrot.slane %v2077_v39, 2  ;;  %v1998_v36 = vunpack.c.l.bf16 %v2948_v26 }
 0x2c6   :  { %v1903_v0 = vpop.xlane.xlu1 %1902  ;;  %v2022_v51 = vmul.f32 %v1990_v12, %v1958_v28 }
 0x2c7   :  { %v2068_v10 = vadd.f32 %v2067_v53, %v2066_v47  ;;  %v1959_v18 = vadd.f32 %v3621_v50, %v1903_v0  ;;  %v1913_v1 = vpop.xlane.xlu0 %1912  ;;  %v2092_v11 = vsel %vm423_vm1, %v2025_v38, 0.0  ;;  %v2053_v47 = vrot.slane %v2052_v56, 1 }
 0x2c8   :  { %v1964_v4 = vadd.f32 %v3621_v50, %v1913_v1  ;;  %v2093_v45 = vadd.f32 %v2092_v11, %v2091_v2  ;;  %v2082_v20 = vsel %vm423_vm1, %v2022_v51, 0.0  ;;  %v2004_v53 = vunpack.c.l.bf16 %v3716_v62 }
 0x2c9   :  { %v2069_v29 = vrot.slane %v2068_v10, 2  ;;  %v2023_v41 = vmul.f32 %v1991_v35, %v1959_v18  ;;  %v2079_v35 = vadd.f32 %v2078_v55, %v2077_v39  ;;  %v2054_v2 = vadd.f32 %v2053_v47, %v2052_v56 }
 0x2ca   :  { %v1915_v15 = vpop.xlane.xlu1 %1914  ;;  %v2094_v37 = vrot.slane %v2093_v45, 4  ;;  %v2028_v33 = vmul.f32 %v1996_v24, %v1964_v4  ;;  %v2063_v39 = vadd.f32 %v2062_v63, %v2061_v59 }
 0x2cb   :  { %v2083_v44 = vsel %vm423_vm1, %v2023_v41, 0.0  ;;  %v1909_v58 = vpop.xlane.xlu0 %1908  ;;  %v1965_v52 = vadd.f32 %v3621_v50, %v1915_v15  ;;  %v2070_v17 = vadd.f32 %v2069_v29, %v2068_v10  ;;  %v2080_v25 = vrot.slane %v2079_v35, 1 }
 0x2cc   :  { %v2084_v54 = vadd.f32 %v2083_v44, %v2082_v20  ;;  %v1962_v13 = vadd.f32 %v3621_v50, %v1909_v58  ;;  %v2095_v46 = vadd.f32 %v2094_v37, %v2093_v45  ;;  %v2109_v12 = vsel %vm423_vm1, %v2028_v33, 0.0  ;;  %v2951_v45 = vld [vmem:[%s3813_s2 + $0x5c] sm:$0xf] }
 0x2cd   :  { %v2029_v7 = vmul.f32 %v1997_v43, %v1965_v52  ;;  %v2071_v30 = vrot.slane %v2070_v17, 1  ;;  %v2005_v41 = vunpack.c.l.bf16 %v2951_v45  ;;  %v2207_v20 = vsel %vm2206_vm2, %v2063_v39, %v2054_v2 }
 0x2ce   :  { %v2085_v6 = vrot.slane %v2084_v54, 4  ;;  %v1911_v9 = vpop.xlane.xlu1 %1910  ;;  %v2026_v60 = vmul.f32 %v1994_v32, %v1962_v13  ;;  %v2096_v42 = vrot.slane %v2095_v46, 2  ;;  %v2952_v13 = vld [vmem:[%s3813_s2 + $0x50] sm:$0xf] }
 0x2cf   :  { %v1963_v31 = vadd.f32 %v3621_v50, %v1911_v9  ;;  %v1921_v5 = vpop.xlane.xlu0 %1920  ;;  %v2110_v14 = vsel %vm423_vm1, %v2029_v7, 0.0  ;;  %v2072_v4 = vadd.f32 %v2071_v30, %v2070_v17  ;;  %v2002_v59 = vunpack.c.l.bf16 %v2952_v13 }
 0x2d0   :  { %v2086_v27 = vadd.f32 %v2085_v6, %v2084_v54  ;;  %v2111_v16 = vadd.f32 %v2110_v14, %v2109_v12  ;;  %v2100_v8 = vsel %vm423_vm1, %v2026_v60, 0.0  ;;  %v1968_v51 = vadd.f32 %v3621_v50, %v1921_v5 }
 0x2d1   :  { %v2027_v28 = vmul.f32 %v1995_v40, %v1963_v31  ;;  %v2097_v32 = vadd.f32 %v2096_v42, %v2095_v46  ;;  %v2209_v54 = vsel %vm2208_vm3, %v2072_v4, %v2207_v20 }
 0x2d2   :  { %v2087_v38 = vrot.slane %v2086_v27, 2  ;;  %v2112_v0 = vrot.slane %v2111_v16, 4  ;;  %v2032_v40 = vmul.f32 %v2000_v22, %v1968_v51  ;;  %v2954_v51 = vld [vmem:[%s3813_s2 + $0x68] sm:$0xf] }
 0x2d3   :  { %v2101_v10 = vsel %vm423_vm1, %v2027_v28, 0.0  ;;  %v1923_v18 = vpop.xlane.xlu1 %1922  ;;  %v1917_v1 = vpop.xlane.xlu0 %1916  ;;  %v2098_v55 = vrot.slane %v2097_v32, 1 }
 0x2d4   :  { %v2088_v11 = vadd.f32 %v2087_v38, %v2086_v27  ;;  %v2102_v21 = vadd.f32 %v2101_v10, %v2100_v8  ;;  %v1969_v24 = vadd.f32 %v3621_v50, %v1923_v18  ;;  %v2113_v19 = vadd.f32 %v2112_v0, %v2111_v16 }
 0x2d5   :  { %v1966_v29 = vadd.f32 %v3621_v50, %v1917_v1  ;;  %v2127_v46 = vsel %vm423_vm1, %v2032_v40, 0.0  ;;  %v2099_v28 = vadd.f32 %v2098_v55, %v2097_v32  ;;  %v2008_v18 = vunpack.c.l.bf16 %v2954_v51  ;;  %v2955_v1 = vld [vmem:[%s3813_s2 + $0x6c] sm:$0xf] }
 0x2d6   :  { %v2089_v3 = vrot.slane %v2088_v11, 1  ;;  %v2103_v43 = vrot.slane %v2102_v21, 4  ;;  %v2033_v15 = vmul.f32 %v2001_v49, %v1969_v24  ;;  %v2114_v48 = vrot.slane %v2113_v19, 2 }
 0x2d7   :  { %v1919_v56 = vpop.xlane.xlu1 %1918  ;;  %v1929_v37 = vpop.xlane.xlu0 %1928  ;;  %v2030_v52 = vmul.f32 %v1998_v36, %v1966_v29  ;;  %v2081_v49 = vadd.f32 %v2080_v25, %v2079_v35  ;;  %v2009_v2 = vunpack.c.l.bf16 %v2955_v1 }
 0x2d8   :  { %v2104_v44 = vadd.f32 %v2103_v43, %v2102_v21  ;;  %v1967_v58 = vadd.f32 %v3621_v50, %v1919_v56  ;;  %v2115_v33 = vadd.f32 %v2114_v48, %v2113_v19  ;;  %v2090_v17 = vadd.f32 %v2089_v3, %v2088_v11  ;;  %v2956_v21 = vld [vmem:[%s3813_s2 + $0x60] sm:$0xf] }
 0x2d9   :  { %v2128_v22 = vsel %vm423_vm1, %v2033_v15, 0.0  ;;  %v1972_v6 = vadd.f32 %v3621_v50, %v1929_v37  ;;  %v2211_v36 = vsel %vm2210_vm4, %v2081_v49, %v2209_v54  ;;  %v2118_v30 = vsel %vm423_vm1, %v2030_v52, 0.0 }
 0x2da   :  { %v2105_v23 = vrot.slane %v2104_v44, 2  ;;  %v2031_v34 = vmul.f32 %v1999_v61, %v1967_v58  ;;  %v2116_v57 = vrot.slane %v2115_v33, 1  ;;  %v2129_v47 = vadd.f32 %v2128_v22, %v2127_v46  ;;  %v2953_v61 = vld [vmem:[%s3813_s2 + $0x54] sm:$0xf]  ;;  %v2957_v58 = vld [vmem:[%s3813_s2 + $0x64] sm:$0xf] }
 0x2db   :  { %v1931_v7 = vpop.xlane.xlu1 %1930  ;;  %v1925_v9 = vpop.xlane.xlu0 %1924  ;;  %v2003_v27 = vunpack.c.l.bf16 %v2953_v61  ;;  %v2213_v12 = vsel %vm2212_vm5, %v2090_v17, %v2211_v36  ;;  %v2036_v35 = vmul.f32 %v2004_v53, %v1972_v6  ;;  %v2006_v24 = vunpack.c.l.bf16 %v2956_v21 }
 0x2dc   :  { %v2106_v60 = vadd.f32 %v2105_v23, %v2104_v44  ;;  %v2119_v31 = vsel %vm423_vm1, %v2031_v34, 0.0  ;;  %v1973_v5 = vadd.f32 %v3621_v50, %v1931_v7  ;;  %v1970_v26 = vadd.f32 %v3621_v50, %v1925_v9  ;;  %v2958_v9 = vld [vmem:[%s3813_s2 + $0x70] sm:$0xf] }
 0x2dd   :  { %v2120_v63 = vadd.f32 %v2119_v31, %v2118_v30  ;;  %v2117_v11 = vadd.f32 %v2116_v57, %v2115_v33  ;;  %v2215_v62 = vsel %vm2214_vm6, %v2099_v28, %v2213_v12  ;;  %v2130_v19 = vrot.slane %v2129_v47, 4 }
 0x2de   :  { %v2107_v14 = vrot.slane %v2106_v60, 1  ;;  %v2037_v16 = vmul.f32 %v2005_v41, %v1973_v5  ;;  %v2034_v42 = vmul.f32 %v2002_v59, %v1970_v26  ;;  %v2145_v3 = vsel %vm423_vm1, %v2036_v35, 0.0  ;;  %v2959_v26 = vld [vmem:[%s3813_s2 + $0x74] sm:$0xf] }
 0x2df   :  { %v1927_v38 = vpop.xlane.xlu1 %1926  ;;  %v1937_v0 = vpop.xlane.xlu0 %1936  ;;  %v2121_v39 = vrot.slane %v2120_v63, 4  ;;  %v2007_v54 = vunpack.c.l.bf16 %v2957_v58  ;;  %v2131_v33 = vadd.f32 %v2130_v19, %v2129_v47  ;;  %v2011_v36 = vunpack.c.l.bf16 %v2959_v26 }
 0x2e0   :  { %v2108_v8 = vadd.f32 %v2107_v14, %v2106_v60  ;;  %v1971_v10 = vadd.f32 %v3621_v50, %v1927_v38  ;;  %v1976_v53 = vadd.f32 %v3621_v50, %v1937_v0  ;;  %v2146_v29 = vsel %vm423_vm1, %v2037_v16, 0.0 }
 0x2e1   :  { %v2136_v43 = vsel %vm423_vm1, %v2034_v42, 0.0  ;;  %v2147_v37 = vadd.f32 %v2146_v29, %v2145_v3  ;;  %v2122_v52 = vadd.f32 %v2121_v39, %v2120_v63  ;;  %v2010_v60 = vunpack.c.l.bf16 %v2958_v9  ;;  %v2960_v42 = vld [vmem:[%s3813_s2 + $0x78] sm:$0xf] }
 0x2e2   :  { %v2217_v4 = vsel %vm2216_vm7, %v2108_v8, %v2215_v62  ;;  %v2035_v45 = vmul.f32 %v2003_v27, %v1971_v10  ;;  %v2040_v48 = vmul.f32 %v2008_v18, %v1976_v53  ;;  %v2132_v57 = vrot.slane %v2131_v33, 2 }
 0x2e3   :  { %v2219_v41 = vsel %vm2218_vm8, %v2117_v11, %v2217_v4  ;;  %v1939_v15 = vpop.xlane.xlu1 %1938  ;;  %v1933_v25 = vpop.xlane.xlu0 %1932  ;;  %v2148_v55 = vrot.slane %v2147_v37, 4  ;;  %v2123_v5 = vrot.slane %v2122_v52, 2  ;;  %v2012_v38 = vunpack.c.l.bf16 %v2960_v42 }
 0x2e4   :  { %2229 = vst.msk [vmem:[%s3820_s10] sm:$0xff] %vm423_vm1, %v2219_v41  ;;  %v2137_v32 = vsel %vm423_vm1, %v2035_v45, 0.0  ;;  %v1977_v40 = vadd.f32 %v3621_v50, %v1939_v15  ;;  %v1974_v56 = vadd.f32 %v3621_v50, %v1933_v25  ;;  %v2163_v17 = vsel %vm423_vm1, %v2040_v48, 0.0 }
 0x2e5   :  { %v2138_v20 = vadd.f32 %v2137_v32, %v2136_v43  ;;  %v2149_v30 = vadd.f32 %v2148_v55, %v2147_v37  ;;  %v2124_v8 = vadd.f32 %v2123_v5, %v2122_v52  ;;  %v2133_v51 = vadd.f32 %v2132_v57, %v2131_v33 }
 0x2e6   :  { %v2041_v44 = vmul.f32 %v2009_v2, %v1977_v40  ;;  %v2038_v22 = vmul.f32 %v2006_v24, %v1974_v56  ;;  %v2961_v2 = vld [vmem:[%s3813_s2 + $0x7c] sm:$0xf] }
 0x2e7   :  { %v2139_v13 = vrot.slane %v2138_v20, 4  ;;  %v1935_v59 = vpop.xlane.xlu1 %1934  ;;  %v2013_v11 = vunpack.c.l.bf16 %v2961_v2  ;;  %v2150_v53 = vrot.slane %v2149_v30, 2  ;;  %v2125_v41 = vrot.slane %v2124_v8, 1 }
 0x2e8   :  { %v2164_v23 = vsel %vm423_vm1, %v2041_v44, 0.0  ;;  %v1975_v34 = vadd.f32 %v3621_v50, %v1935_v59  ;;  %v1941_v49 = vpop.xlane.xlu0 %1940  ;;  %v2154_v61 = vsel %vm423_vm1, %v2038_v22, 0.0  ;;  %v2134_v43 = vrot.slane %v2133_v51, 1 }
 0x2e9   :  { %v2140_v46 = vadd.f32 %v2139_v13, %v2138_v20  ;;  %v2165_v6 = vadd.f32 %v2164_v23, %v2163_v17  ;;  %v1978_v31 = vadd.f32 %v3621_v50, %v1941_v49  ;;  %v2151_v32 = vadd.f32 %v2150_v53, %v2149_v30 }
 0x2ea   :  { %v2039_v7 = vmul.f32 %v2007_v54, %v1975_v34  ;;  %v2135_v54 = vadd.f32 %v2134_v43, %v2133_v51 }
 0x2eb   :  { %v2141_v47 = vrot.slane %v2140_v46, 2  ;;  %v2166_v16 = vrot.slane %v2165_v6, 4  ;;  %v2042_v63 = vmul.f32 %v2010_v60, %v1978_v31  ;;  %v2152_v13 = vrot.slane %v2151_v32, 1 }
 0x2ec   :  { %v2155_v27 = vsel %vm423_vm1, %v2039_v7, 0.0  ;;  %v1943_v12 = vpop.xlane.xlu1 %1942  ;;  %v1945_v14 = vpop.xlane.xlu0 %1944 }
 0x2ed   :  { %v2156_v28 = vadd.f32 %v2155_v27, %v2154_v61  ;;  %v1979_v35 = vadd.f32 %v3621_v50, %v1943_v12  ;;  %v1980_v0 = vadd.f32 %v3621_v50, %v1945_v14  ;;  %v2142_v18 = vadd.f32 %v2141_v47, %v2140_v46 }
 0x2ee   :  { %v2167_v21 = vadd.f32 %v2166_v16, %v2165_v6  ;;  %v2172_v19 = vsel %vm423_vm1, %v2042_v63, 0.0  ;;  %v2153_v6 = vadd.f32 %v2152_v13, %v2151_v32 }
 0x2ef   :  { %v2157_v10 = vrot.slane %v2156_v28, 4  ;;  %v2043_v1 = vmul.f32 %v2011_v36, %v1979_v35  ;;  %v2044_v45 = vmul.f32 %v2012_v38, %v1980_v0  ;;  %v2143_v15 = vrot.slane %v2142_v18, 1 }
 0x2f0   :  { %v1947_v62 = vpop.xlane.xlu1 %1946  ;;  %v2168_v48 = vrot.slane %v2167_v21, 2 }
 0x2f1   :  { %v2158_v24 = vadd.f32 %v2157_v10, %v2156_v28  ;;  %v1981_v4 = vadd.f32 %v3621_v50, %v1947_v62  ;;  %v2173_v29 = vsel %vm423_vm1, %v2043_v1, 0.0  ;;  %v2181_v37 = vsel %vm423_vm1, %v2044_v45, 0.0 }
 0x2f2   :  { %v2174_v3 = vadd.f32 %v2173_v29, %v2172_v19  ;;  %v2126_v50 = vadd.f32 %v2125_v41, %v2124_v8  ;;  %v2144_v33 = vadd.f32 %v2143_v15, %v2142_v18  ;;  %v2169_v59 = vadd.f32 %v2168_v48, %v2167_v21 }
 0x2f3   :  { %v2159_v39 = vrot.slane %v2158_v24, 2  ;;  %v2045_v25 = vmul.f32 %v2013_v11, %v1981_v4 }
 0x2f4   :  { %v2175_v56 = vrot.slane %v2174_v3, 4  ;;  %v2220_v22 = vsel %vm2206_vm2, %v2135_v54, %v2126_v50  ;;  %v2170_v7 = vrot.slane %v2169_v59, 1 }
 0x2f5   :  { %v2160_v40 = vadd.f32 %v2159_v39, %v2158_v24  ;;  %v2182_v20 = vsel %vm423_vm1, %v2045_v25, 0.0  ;;  %v2221_v55 = vsel %vm2208_vm3, %v2144_v33, %v2220_v22 }
 0x2f6   :  { %v2176_v44 = vadd.f32 %v2175_v56, %v2174_v3  ;;  %v2183_v58 = vadd.f32 %v2182_v20, %v2181_v37  ;;  %v2222_v31 = vsel %vm2210_vm4, %v2153_v6, %v2221_v55  ;;  %v2171_v57 = vadd.f32 %v2170_v7, %v2169_v59 }
 0x2f7   :  { %v2161_v52 = vrot.slane %v2160_v40, 1 }
 0x2f8   :  { %v2177_v17 = vrot.slane %v2176_v44, 2  ;;  %v2184_v23 = vrot.slane %v2183_v58, 4 }
 0x2f9   :  { %v2162_v46 = vadd.f32 %v2161_v52, %v2160_v40 }
 0x2fa   :  { %v2178_v34 = vadd.f32 %v2177_v17, %v2176_v44  ;;  %v2185_v49 = vadd.f32 %v2184_v23, %v2183_v58 }
 0x2fb   :  { %v2223_v26 = vsel %vm2212_vm5, %v2162_v46, %v2222_v31 }
 0x2fc   :  { %v2179_v9 = vrot.slane %v2178_v34, 1  ;;  %v2186_v60 = vrot.slane %v2185_v49, 2  ;;  %v2224_v61 = vsel %vm2214_vm6, %v2171_v57, %v2223_v26 }
 0x2fe   :  { %v2187_v5 = vadd.f32 %v2186_v60, %v2185_v49  ;;  %v2180_v36 = vadd.f32 %v2179_v9, %v2178_v34 }
 0x300   :  { %v2188_v47 = vrot.slane %v2187_v5, 1  ;;  %v2225_v12 = vsel %vm2216_vm7, %v2180_v36, %v2224_v61 }
 0x302   :  { %v2189_v27 = vadd.f32 %v2188_v47, %v2187_v5 }
 0x304   :  { %v2226_v14 = vsel %vm2218_vm8, %v2189_v27, %v2225_v12 }
 0x305   :  { %2230 = vst.msk [vmem:[%s3820_s10 + $0x8] sm:$0xff] %vm423_vm1, %v2226_v14 }

</bundles_post_ra>
